<compile_context>
chip_gen: v7x
topology: tpu7x:2x2x1
jax: 0.10.0
libtpu: 0.0.40
codegen_flags: <defaults>
</compile_context>

<pallas_src>
import math

import jax
import jax.numpy as jnp
from jax.experimental import pallas as pl
from jax.experimental.pallas import tpu as pltpu

NOISE_DIM = 128
H1 = 256
H2 = 512
IMG_DIM = 3 * 32 * 32  # 3072
TN = 768               # output / w3 tile width (3072 / 768 = 4 tiles)


def generator_kernel(x_ref, w1_ref, b1_ref, w2_ref, b2_ref, w3_ref, b3_ref, o_ref):
    # Linear(128 -> 256) + ReLU   (bf16 MXU inputs, f32 accumulate/epilogue)
    x = x_ref[...].astype(jnp.bfloat16)
    h1 = jnp.dot(x, w1_ref[...], preferred_element_type=jnp.float32)
    h1 = jnp.maximum(h1 + b1_ref[...], 0.0)
    # Linear(256 -> 512) + ReLU
    h2 = jnp.dot(h1.astype(jnp.bfloat16), w2_ref[...],
                 preferred_element_type=jnp.float32)
    h2 = jnp.maximum(h2 + b2_ref[...], 0.0)
    # Linear(512 -> 3072) + Tanh, one TN-wide output tile per grid step
    h3 = jnp.dot(h2.astype(jnp.bfloat16), w3_ref[...],
                 preferred_element_type=jnp.float32)
    o_ref[...] = jnp.tanh(h3 + b3_ref[...]).astype(o_ref.dtype)


def generator_forward(x, params):
    w1, b1, w2, b2, w3, b3 = params
    B = x.shape[0]
    n_tiles = IMG_DIM // TN

    # Constant index map => block stays resident in VMEM across grid steps.
    const = lambda shape: pl.BlockSpec(shape, lambda j: (0, 0))

    return pl.pallas_call(
        generator_kernel,
        out_shape=jax.ShapeDtypeStruct((B, IMG_DIM), jnp.float32),
        grid=(n_tiles,),
        in_specs=[
            const((B, NOISE_DIM)),                       # x   (f32, resident)
            const((NOISE_DIM, H1)),                      # w1  (bf16, resident)
            const((1, H1)),                              # b1  (f32, resident)
            const((H1, H2)),                             # w2  (bf16, resident)
            const((1, H2)),                              # b2  (f32, resident)
            pl.BlockSpec((H2, TN), lambda j: (0, j)),    # w3 tile (bf16, streamed)
            pl.BlockSpec((1, TN), lambda j: (0, j)),     # b3 tile (f32, streamed)
        ],
        out_specs=pl.BlockSpec((B, TN), lambda j: (0, j)),
        compiler_params=pltpu.CompilerParams(
            dimension_semantics=("parallel",),
            vmem_limit_bytes=32 << 20,
        ),
    )(x, w1, b1, w2, b2, w3, b3)


def init_params(key):
    """nn.Linear default init (U[-1/sqrt(fan_in), 1/sqrt(fan_in)]).

    Weights are stored [in, out] (kernel computes x @ W, == PyTorch x @ W.T)
    and cast to bf16; biases stay f32.
    """
    def linear(key, fan_in, fan_out):
        kw, kb = jax.random.split(key)
        bound = 1.0 / math.sqrt(fan_in)
        w = jax.random.uniform(kw, (fan_in, fan_out), jnp.float32, -bound, bound)
        b = jax.random.uniform(kb, (1, fan_out), jnp.float32, -bound, bound)
        return w.astype(jnp.bfloat16), b

    k1, k2, k3 = jax.random.split(key, 3)
    w1, b1 = linear(k1, NOISE_DIM, H1)
    w2, b2 = linear(k2, H1, H2)
    w3, b3 = linear(k3, H2, IMG_DIM)
    return (w1, b1, w2, b2, w3, b3)


def reference_forward(x, params):
    """Pure-JAX reference with the same bf16-input / f32-accumulate numerics."""
    w1, b1, w2, b2, w3, b3 = params
    h1 = jnp.dot(x.astype(jnp.bfloat16), w1, preferred_element_type=jnp.float32)
    h1 = jnp.maximum(h1 + b1, 0.0)
    h2 = jnp.dot(h1.astype(jnp.bfloat16), w2, preferred_element_type=jnp.float32)
    h2 = jnp.maximum(h2 + b2, 0.0)
    h3 = jnp.dot(h2.astype(jnp.bfloat16), w3, preferred_element_type=jnp.float32)
    return jnp.tanh(h3 + b3)


if __name__ == "__main__":
    key = jax.random.PRNGKey(0)
    kx, kp = jax.random.split(key)

    batch = 8
    x = jax.random.normal(kx, (batch, NOISE_DIM), jnp.float32)
    params = init_params(kp)

    out = generator_forward(x, params)
    out = jax.block_until_ready(out)

    ref = reference_forward(x, params)
    assert out.shape == (batch, IMG_DIM)
    # bf16 weights => slightly looser tolerance than an f32-only version.
    assert jnp.allclose(out, ref, atol=2e-2, rtol=2e-2), "mismatch vs reference"

    print("KERNEL_OK")
</pallas_src>

<mosaic_0001>
module attributes {stable_mosaic.version = 11 : i64} {
  func.func @generator_kernel(%arg0: i32, %arg1: memref<8x128xf32, #tpu.memory_space<vmem>>, %arg2: memref<128x256xbf16, #tpu.memory_space<vmem>>, %arg3: memref<1x256xf32, #tpu.memory_space<vmem>>, %arg4: memref<256x512xbf16, #tpu.memory_space<vmem>>, %arg5: memref<1x512xf32, #tpu.memory_space<vmem>>, %arg6: memref<512x768xbf16, #tpu.memory_space<vmem>>, %arg7: memref<1x768xf32, #tpu.memory_space<vmem>>, %arg8: memref<8x768xf32, #tpu.memory_space<vmem>>) attributes {dimension_semantics = [#tpu.dimension_semantics<parallel>], iteration_bounds = array<i64: 4>, scalar_prefetch = 0 : i64, scratch_operands = 0 : i64, tpu.core_type = #tpu.core_type<tc>, window_params = [{pipeline_mode = #tpu.pipeline_mode<synchronous>, transform_indices = @transform_0, window_bounds = array<i64: 8, 128>}, {pipeline_mode = #tpu.pipeline_mode<synchronous>, transform_indices = @transform_1, window_bounds = array<i64: 128, 256>}, {pipeline_mode = #tpu.pipeline_mode<synchronous>, transform_indices = @transform_2, window_bounds = array<i64: 1, 256>}, {pipeline_mode = #tpu.pipeline_mode<synchronous>, transform_indices = @transform_3, window_bounds = array<i64: 256, 512>}, {pipeline_mode = #tpu.pipeline_mode<synchronous>, transform_indices = @transform_4, window_bounds = array<i64: 1, 512>}, {transform_indices = @transform_5, window_bounds = array<i64: 512, 768>}, {transform_indices = @transform_6, window_bounds = array<i64: 1, 768>}, {transform_indices = @transform_7, window_bounds = array<i64: 8, 768>}]} {
    %c0 = arith.constant 0 : index
    %c0_0 = arith.constant 0 : index
    %0 = vector.load %arg1[%c0, %c0_0] : memref<8x128xf32, #tpu.memory_space<vmem>>, vector<8x128xf32>
    %1 = arith.truncf %0 : vector<8x128xf32> to vector<8x128xbf16>
    %c0_1 = arith.constant 0 : index
    %c0_2 = arith.constant 0 : index
    %2 = vector.load %arg2[%c0_1, %c0_2] : memref<128x256xbf16, #tpu.memory_space<vmem>>, vector<128x256xbf16>
    %cst = arith.constant dense<0.000000e+00> : vector<8x256xf32>
    %3 = tpu.matmul %1, %2, %cst {dimension_numbers = #tpu.dot_dimension_numbers<[1], [0], [0], [1], [0, 0, 1, 1], [], []>} : vector<8x128xbf16>, vector<128x256xbf16>, vector<8x256xf32> -> vector<8x256xf32>
    %c0_3 = arith.constant 0 : index
    %c0_4 = arith.constant 0 : index
    %4 = vector.load %arg3[%c0_3, %c0_4] : memref<1x256xf32, #tpu.memory_space<vmem>>, vector<1x256xf32>
    %5 = vector.broadcast %4 : vector<1x256xf32> to vector<8x256xf32>
    %6 = arith.addf %3, %5 : vector<8x256xf32>
    %cst_5 = arith.constant 0.000000e+00 : f32
    %7 = vector.broadcast %cst_5 : f32 to vector<8x256xf32>
    %8 = arith.maximumf %6, %7 : vector<8x256xf32>
    %9 = arith.truncf %8 : vector<8x256xf32> to vector<8x256xbf16>
    %c0_6 = arith.constant 0 : index
    %c0_7 = arith.constant 0 : index
    %10 = vector.load %arg4[%c0_6, %c0_7] : memref<256x512xbf16, #tpu.memory_space<vmem>>, vector<256x512xbf16>
    %cst_8 = arith.constant dense<0.000000e+00> : vector<8x512xf32>
    %11 = tpu.matmul %9, %10, %cst_8 {dimension_numbers = #tpu.dot_dimension_numbers<[1], [0], [0], [1], [0, 0, 1, 1], [], []>} : vector<8x256xbf16>, vector<256x512xbf16>, vector<8x512xf32> -> vector<8x512xf32>
    %c0_9 = arith.constant 0 : index
    %c0_10 = arith.constant 0 : index
    %12 = vector.load %arg5[%c0_9, %c0_10] : memref<1x512xf32, #tpu.memory_space<vmem>>, vector<1x512xf32>
    %13 = vector.broadcast %12 : vector<1x512xf32> to vector<8x512xf32>
    %14 = arith.addf %11, %13 : vector<8x512xf32>
    %cst_11 = arith.constant 0.000000e+00 : f32
    %15 = vector.broadcast %cst_11 : f32 to vector<8x512xf32>
    %16 = arith.maximumf %14, %15 : vector<8x512xf32>
    %17 = arith.truncf %16 : vector<8x512xf32> to vector<8x512xbf16>
    %c0_12 = arith.constant 0 : index
    %c0_13 = arith.constant 0 : index
    %18 = vector.load %arg6[%c0_12, %c0_13] : memref<512x768xbf16, #tpu.memory_space<vmem>>, vector<512x768xbf16>
    %cst_14 = arith.constant dense<0.000000e+00> : vector<8x768xf32>
    %19 = tpu.matmul %17, %18, %cst_14 {dimension_numbers = #tpu.dot_dimension_numbers<[1], [0], [0], [1], [0, 0, 1, 1], [], []>} : vector<8x512xbf16>, vector<512x768xbf16>, vector<8x768xf32> -> vector<8x768xf32>
    %c0_15 = arith.constant 0 : index
    %c0_16 = arith.constant 0 : index
    %20 = vector.load %arg7[%c0_15, %c0_16] : memref<1x768xf32, #tpu.memory_space<vmem>>, vector<1x768xf32>
    %21 = vector.broadcast %20 : vector<1x768xf32> to vector<8x768xf32>
    %22 = arith.addf %19, %21 : vector<8x768xf32>
    %23 = math.tanh %22 : vector<8x768xf32>
    %c0_17 = arith.constant 0 : index
    %c0_18 = arith.constant 0 : index
    %24 = vector.load %arg8[%c0_17, %c0_18] : memref<8x768xf32, #tpu.memory_space<vmem>>, vector<8x768xf32>
    tpu.vector_store %arg8[%c0_17, %c0_18], %23 {strides = array<i32>} : memref<8x768xf32, #tpu.memory_space<vmem>>, vector<8x768xf32>,
    return
  }
  func.func @transform_0(%arg0: i32) -> (i32, i32) {
    %c0_i32 = arith.constant 0 : i32
    %c0_i32_0 = arith.constant 0 : i32
    %c0_i32_1 = arith.constant 0 : i32
    return %c0_i32, %c0_i32_0 : i32, i32
  }
  func.func @transform_1(%arg0: i32) -> (i32, i32) {
    %c0_i32 = arith.constant 0 : i32
    %c0_i32_0 = arith.constant 0 : i32
    %c0_i32_1 = arith.constant 0 : i32
    return %c0_i32, %c0_i32_0 : i32, i32
  }
  func.func @transform_2(%arg0: i32) -> (i32, i32) {
    %c0_i32 = arith.constant 0 : i32
    %c0_i32_0 = arith.constant 0 : i32
    %c0_i32_1 = arith.constant 0 : i32
    return %c0_i32, %c0_i32_0 : i32, i32
  }
  func.func @transform_3(%arg0: i32) -> (i32, i32) {
    %c0_i32 = arith.constant 0 : i32
    %c0_i32_0 = arith.constant 0 : i32
    %c0_i32_1 = arith.constant 0 : i32
    return %c0_i32, %c0_i32_0 : i32, i32
  }
  func.func @transform_4(%arg0: i32) -> (i32, i32) {
    %c0_i32 = arith.constant 0 : i32
    %c0_i32_0 = arith.constant 0 : i32
    %c0_i32_1 = arith.constant 0 : i32
    return %c0_i32, %c0_i32_0 : i32, i32
  }
  func.func @transform_5(%arg0: i32) -> (i32, i32) {
    %c0_i32 = arith.constant 0 : i32
    %c0_i32_0 = arith.constant 0 : i32
    return %c0_i32, %arg0 : i32, i32
  }
  func.func @transform_6(%arg0: i32) -> (i32, i32) {
    %c0_i32 = arith.constant 0 : i32
    %c0_i32_0 = arith.constant 0 : i32
    return %c0_i32, %arg0 : i32, i32
  }
  func.func @transform_7(%arg0: i32) -> (i32, i32) {
    %c0_i32 = arith.constant 0 : i32
    %c0_i32_0 = arith.constant 0 : i32
    return %c0_i32, %arg0 : i32, i32
  }
}

</mosaic_0001>

<bundles_post_ra>
// kernel: tpu_custom_call.1
= control target key start
LH: loop header
LB: loop body
LE: loop exit
PB: predicated region body
PF: predicated region fallthrough
CT: control target
= control target key end

     0   :  { %s4402_s0 = inlined_call_operand.hbm [shape: f32[8,128], index: 0, kind: input, shape index: {}]   ;;  %s4403_s1 = inlined_call_operand.hbm [shape: bf16[128,256], index: 1, kind: input, shape index: {}]   ;;  %s4404_s2 = inlined_call_operand.hbm [shape: f32[1,256], index: 2, kind: input, shape index: {}]   ;;  %s4405_s3 = inlined_call_operand.hbm [shape: bf16[256,512], index: 3, kind: input, shape index: {}]   ;;  %s4406_s4 = inlined_call_operand.hbm [shape: f32[1,512], index: 4, kind: input, shape index: {}]   ;;  %s4407_s5 = inlined_call_operand.hbm [shape: bf16[512,3072], index: 5, kind: input, shape index: {}]   ;;  %s4408_s6 = inlined_call_operand.hbm [shape: f32[1,3072], index: 6, kind: input, shape index: {}]   ;;  %s4409_s7 = inlined_call_operand.hbm [shape: f32[8,3072], index: 7, kind: output, shape index: {}]  }
   0x1   :  { %4425 = sst [smem:[#allocation24_spill]] %s4403_s1 }
   0x2   :  { %4426 = sst [smem:[#allocation25_spill]] %s4405_s3 }
   0x3   :  { %4427 = sst [smem:[#allocation26_spill]] %s4407_s5 }
   0x4   :  { %4428 = sst [smem:[#allocation27_spill]] %s4409_s7 }
   0x5   :  { %12 = vsyncpa [#allocation3], 0 }
   0x6   :  { %13 = vsyncpa [#allocation6], 0 }
   0x7   :  { %14 = vsyncpa [#allocation9], 0 }
   0x8   :  { %15 = vsyncpa [#allocation12], 0 }
   0x9   :  { %17 = vsyncpa [#allocation12 + $0x1], 0 }
   0xa   :  { %18 = vsyncpa [#allocation4], 0 }
   0xb   :  { %20 = vsyncpa [#allocation4 + $0x1], 0  ;;  %s3834_s24 = smov 0   ;;  %s3836_s25 = smov 0  }
   0xc   :  { %s3838_s26 = smov 0   ;;  %s3840_s27 = smov 0  }
   0xd LB: > { %4429 = sst [smem:[#allocation20_spill]] %s3764_s24  ;;  %s3855_s28 = sadd.s32 4294967295, %s3776_s27   ;;  %s3776_s27 = sphi %s3840_s27, %s4462_s27   ;;  %s3772_s26 = sphi %s3838_s26, %s4466_s26   ;;  %s3768_s25 = sphi %s3836_s25, %s4465_s25   ;;  %s3764_s24 = sphi %s3834_s24, %s4464_s24  }
   0xe   : > { %s2651_s29 = sadd.s32 4294967294, %s3776_s27   ;;  %p151_p0 = scmp.ne.s32.totalorder %s3768_s25, %s3764_s24 }
   0xf   : > { %p4410_p1 = scmp.eq.s32.totalorder %s3855_s28, 0  ;;  %p207_p3 = scmp.eq.s32.totalorder %s2651_s29, 3 }
  0x10   : > { %p2652_p5 = scmp.ge.s32.totalorder %s3776_s27, 1  ;;  %p214_p7 = scmp.lt.s32.totalorder %s3776_s27, 5 }
  0x11   : > { %p3864_p4 = por %p4410_p1, %p151_p0  ;;  %p3869_p6 = por %p207_p3, %p151_p0 }
  0x12   : > { %p3874_p8 = pnand %p2652_p5, %p214_p7  ;;  %s3778_s10 = smov [#allocation5]  }
  0x13   : > { %s4430_s30 = scalar_select %p3864_p4, 1, 0 }
  0x14   : > { %s4431_s8 = scalar_select %p3869_p6, 1, 0 }
  0x15   : > { %s4433_s9 = scalar_select %p3874_p8, 1, 0 }
  0x16   : > { %4432 = sst [smem:[#allocation21_spill]] %s4431_s8  ;;  %s237_s11 = sshll.u32 %s3778_s10, 4  ;;  %s238_s11 = int_to_ptr.vmem [resolvable:$true] %s237_s11 }
  0x17   : > { %p2994_p9 = pneg %p3874_p8  ;;  %s3779_s13 = smov [#allocation8]  }
  0x18   : > { %s261_s14 = sshll.u32 %s3779_s13, 4  ;;  %s4435_s1 = sld [smem:[#allocation24_spill]]  ;;  %s3886_s14 = int_to_ptr.vmem [resolvable:$true] %s261_s14 }
  0x19   : > { %p3882_p10 = pnand %p2994_p9, %p4410_p1 }
  0x1b   : > { %s4434_s12 = scalar_select %p3882_p10, 1, 0 }
  0x1c   : > { %p3896_p12 = pneg %p3882_p10 }
  0x1e   : > { %s3498_s17 = scalar_lea.hbm %s4435_s1, 2048 }
  0x1f   : > { %p3499_p11 = scmp.ne.s32.totalorder %s4435_s1, %s3498_s17  ;;  %p3505_p3 = scmp.lt.u32.totalorder %s3498_s17, %s4435_s1 }
  0x21   : > { %p3501_p13 = pnand %p3896_p12, %p3499_p11 }
  0x23   : > { %p3502_p0 = pneg %p3501_p13 }
  0x25   : > { %p3507_p5 = pnand %p3505_p3, %p3502_p0 }
  0x27   : > { %3510 = shalt.err (!%p3507_p5)
}
  0x28   : > { %s3511_s23 = scalar_lea.vmem %s238_s11, 2048  ;;  %p3519_p2 = scmp.lt.s32.totalorder %s238_s11, %s238_s11 }
  0x29   : > { %p3512_p7 = scmp.ne.s32.totalorder %s238_s11, %s3511_s23  ;;  %p3520_p6 = scmp.lt.s32.totalorder %s3511_s23, %s3511_s23 }
  0x2b   : > { %p3514_p9 = pnand %p3512_p7, %p3896_p12  ;;  %p3521_p4 = por %p3520_p6, %p3519_p2 }
  0x2d   : > { %p3515_p1 = pneg %p3514_p9 }
  0x2f   : > { %p3522_p8 = pnand %p3521_p4, %p3515_p1 }
  0x31   : > { %3525 = shalt.err (!%p3522_p8)
}
  0x32   : > { %s3780_s29 = smov 128   ;;  %s3781_s10 = smov 8  }
  0x33   : > { %3000 = dma.hbm_to_vmem [thread:$0]  (!%p3882_p10), %s4435_s1, 2048, %s238_s11, [#allocation6], %s3780_s29, %s3780_s29, %s3781_s10  }
  0x34   : > { %s4437_s3 = sld [smem:[#allocation25_spill]] }
  0x3a   : > { %s3526_s18 = scalar_lea.hbm %s4437_s3, 8192 }
  0x3b   : > { %p3527_p11 = scmp.ne.s32.totalorder %s4437_s3, %s3526_s18  ;;  %p3533_p4 = scmp.lt.u32.totalorder %s3526_s18, %s4437_s3 }
  0x3d   : > { %p3529_p1 = pnand %p3527_p11, %p3896_p12 }
  0x3f   : > { %p3530_p2 = pneg %p3529_p1 }
  0x41   : > { %p3535_p6 = pnand %p3533_p4, %p3530_p2 }
  0x43   : > { %3538 = shalt.err (!%p3535_p6)
}
  0x44   : > { %s3539_s11 = scalar_lea.vmem %s3886_s14, 8192  ;;  %p3547_p3 = scmp.lt.s32.totalorder %s3886_s14, %s3886_s14 }
  0x45   : > { %p3540_p8 = scmp.ne.s32.totalorder %s3886_s14, %s3539_s11  ;;  %p3548_p5 = scmp.lt.s32.totalorder %s3539_s11, %s3539_s11 }
  0x47   : > { %p3542_p13 = pnand %p3540_p8, %p3896_p12  ;;  %p3549_p7 = por %p3548_p5, %p3547_p3 }
  0x49   : > { %p3543_p0 = pneg %p3542_p13 }
  0x4b   : > { %p3550_p9 = pnand %p3549_p7, %p3543_p0 }
  0x4d   : > { %3553 = shalt.err (!%p3550_p9)
}
  0x4e   : > { %s3782_s29 = smov 256   ;;  %s3783_s10 = smov 16  }
  0x4f   : > { %3006 = dma.hbm_to_vmem [thread:$0]  (!%p3882_p10), %s4437_s3, 8192, %s3886_s14, [#allocation9], %s3782_s29, %s3782_s29, %s3783_s10  }
  0x50   : > { %s3936_s16 = sadd.s32 1, %s3776_s27   ;;  %s138_s18 = sadd.s32 1, %s3772_s26 }
  0x51   : > { %4438 = sst [smem:[#allocation22_spill]] %s3936_s16  ;;  %s135_s17 = ssub.s32 %s3776_s27, %s3936_s16 }
  0x52   : > { %p136_p11 = scmp.eq.s32.totalorder %s135_s17, 0  ;;  %p145_p1 = scmp.ne.s32.totalorder %s3772_s26, %s3768_s25 }
  0x53   : > { %p146_p2 = scmp.eq.s32.totalorder %s3776_s27, 0  ;;  %p4440_p6 = scmp.eq.s32.totalorder %s3855_s28, 3 }
  0x54   : > { %s3945_s19 = scalar_select %p136_p11, %s3772_s26, %s138_s18  }
  0x55   : > { %p147_p4 = por %p146_p2, %p145_p1  ;;  %p3949_p8 = por %p4440_p6, %p145_p1 }
  0x56   : > { %4439 = sst [smem:[#allocation23_spill]] %s3945_s19  ;;  %p3026_p13 = scmp.lt.s32.totalorder %s3776_s27, 4 }
  0x57   : > { %s4441_s21 = scalar_select %p3949_p8, 1, 0 }
  0x58   : > { %s286_s22 = sand.u32 1, %s3776_s27   ;;  %s4413_s23 = sand.u32 1, %s3772_s26  }
  0x59   : > { %s2963_s14 = smul.u32 1536, %s4413_s23  ;;  %p3958_p0 = pnand %p3026_p13, %p147_p4 }
  0x5a   : > { %s2942_s29 = smul.u32 384, %s3776_s27  ;;  %s4443_s5 = sld [smem:[#allocation26_spill]] }
  0x5b   : > { %s4442_s11 = scalar_select %p3958_p0, 1, 0 }
  0x5c   : > { %s290_s17 = scalar_lea.vmem [#allocation11], %s2963_s14  ;;  %s3970_s23 = scalar_lea.sflag [#allocation12], %s286_s22 }
  0x5d   : > { %s297_s18 = sshll.u32 %s290_s17, 4  ;;  %p4422_p5 = pneg %p3958_p0  ;;  %s3968_s18 = int_to_ptr.vmem [resolvable:$true] %s297_s18 }
  0x60   : > { %s3966_s15 = scalar_lea.hbm %s4443_s5, %s2942_s29  ;;  %s3559_s13 = scalar_lea.hbm %s4443_s5, 98304 }
  0x61   : > { %s3554_s1 = scalar_lea.hbm %s3966_s15, 24576  ;;  %p3560_p11 = scmp.lt.u32.totalorder %s3966_s15, %s4443_s5 }
  0x62   : > { %p3555_p3 = scmp.ne.s32.totalorder %s3966_s15, %s3554_s1  ;;  %p3561_p1 = scmp.lt.u32.totalorder %s3559_s13, %s3554_s1 }
  0x63   : > { %p3563_p4 = scmp.lt.u32.totalorder %s3554_s1, %s3966_s15 }
  0x64   : > { %p3557_p7 = pnand %p4422_p5, %p3555_p3  ;;  %p3562_p2 = por %p3561_p1, %p3560_p11 }
  0x66   : > { %p3558_p9 = pneg %p3557_p7  ;;  %p3564_p6 = por %p3563_p4, %p3562_p2 }
  0x68   : > { %p3565_p13 = pnand %p3564_p6, %p3558_p9 }
  0x6a   : > { %3568 = shalt.err (!%p3565_p13)
}
  0x6b   : > { %s3569_s22 = scalar_lea.vmem %s3968_s18, 24576  ;;  %s3784_s14 = smov [#allocation11]  }
  0x6c   : > { %p3570_p3 = scmp.ne.s32.totalorder %s3968_s18, %s3569_s22  ;;  %s3574_s17 = sshll.u32 %s3784_s14, 4  ;;  %s3575_s17 = int_to_ptr.vmem [resolvable:$false] %s3574_s17 }
  0x6d   : > { %s3576_s3 = scalar_lea.vmem %s3575_s17, 49152  ;;  %p3577_p10 = scmp.lt.s32.totalorder %s3968_s18, %s3575_s17 }
  0x6e   : > { %p3572_p7 = pnand %p3570_p3, %p4422_p5  ;;  %p3578_p11 = scmp.lt.s32.totalorder %s3576_s3, %s3569_s22 }
  0x70   : > { %p3573_p8 = pneg %p3572_p7  ;;  %p3579_p1 = por %p3578_p11, %p3577_p10 }
  0x72   : > { %p3580_p2 = pnand %p3579_p1, %p3573_p8 }
  0x74   : > { %3583 = shalt.err (!%p3580_p2)
}
  0x75   : > { %s3785_s1 = smov 1536   ;;  %s3786_s19 = smov 384  }
  0x76   : > { %s3787_s29 = smov 24   ;;  %s3788_s10 = smov [#allocation2]  }
  0x77   : > { %3013 = dma.hbm_to_vmem [thread:$0]  (!%p3958_p0), %s3966_s15, 24576, %s3968_s18, %s3970_s23, %s3785_s1, %s3786_s19, %s3787_s29  }
  0x78   : > { %s227_s13 = sshll.u32 %s3788_s10, 4  ;;  %s3789_s14 = smov [#allocation7]   ;;  %s228_s13 = int_to_ptr.vmem [resolvable:$true] %s227_s13 }
  0x79   : > { %s251_s5 = sshll.u32 %s3789_s14, 4  ;;  %s3584_s3 = scalar_lea.hbm %s4402_s0, 128  ;;  %s252_s5 = int_to_ptr.vmem [resolvable:$true] %s251_s5 }
  0x7a   : > { %p3585_p10 = scmp.ne.s32.totalorder %s4402_s0, %s3584_s3  ;;  %p3591_p4 = scmp.lt.u32.totalorder %s3584_s3, %s4402_s0 }
  0x7c   : > { %p3587_p8 = pnand %p3585_p10, %p3896_p12 }
  0x7e   : > { %p3588_p9 = pneg %p3587_p8 }
  0x80   : > { %p3593_p6 = pnand %p3591_p4, %p3588_p9 }
  0x82   : > { %3596 = shalt.err (!%p3593_p6)
}
  0x83   : > { %s3597_s15 = scalar_lea.vmem %s228_s13, 128  ;;  %p3605_p11 = scmp.lt.s32.totalorder %s228_s13, %s228_s13 }
  0x84   : > { %p3598_p13 = scmp.ne.s32.totalorder %s228_s13, %s3597_s15  ;;  %p3606_p1 = scmp.lt.s32.totalorder %s3597_s15, %s3597_s15 }
  0x86   : > { %p3600_p3 = pnand %p3598_p13, %p3896_p12  ;;  %p3607_p2 = por %p3606_p1, %p3605_p11 }
  0x88   : > { %p3601_p7 = pneg %p3600_p3 }
  0x8a   : > { %p3608_p5 = pnand %p3607_p2, %p3601_p7 }
  0x8c   : > { %3611 = shalt.err (!%p3608_p5)
}
  0x8d   : > { %p4444_p10 = scmp.ne.s32.totalorder %s4434_s12, 0  ;;  %s3612_s18 = scalar_lea.hbm %s4404_s2, 32 }
  0x8e   : > { %p3613_p8 = scmp.ne.s32.totalorder %s4404_s2, %s3612_s18  ;;  %p3619_p5 = scmp.lt.u32.totalorder %s3612_s18, %s4404_s2 }
  0x8f   : > { %2997 = dma.hbm_to_vmem [thread:$0]  (!%p4444_p10), %s4402_s0, 128, %s228_s13, [#allocation3]  }
  0x90   : > { %p3615_p9 = pnand %p3613_p8, %p3896_p12 }
  0x92   : > { %p3616_p4 = pneg %p3615_p9 }
  0x94   : > { %p3621_p6 = pnand %p3619_p5, %p3616_p4 }
  0x96   : > { %3624 = shalt.err (!%p3621_p6)
}
  0x97   : > { %s3625_s14 = scalar_lea.vmem %s252_s5, 32  ;;  %p3633_p11 = scmp.lt.s32.totalorder %s252_s5, %s252_s5 }
  0x98   : > { %p3626_p13 = scmp.ne.s32.totalorder %s252_s5, %s3625_s14  ;;  %p3634_p1 = scmp.lt.s32.totalorder %s3625_s14, %s3625_s14 }
  0x9a   : > { %p3628_p3 = pnand %p3626_p13, %p3896_p12  ;;  %p3635_p2 = por %p3634_p1, %p3633_p11 }
  0x9c   : > { %p3629_p7 = pneg %p3628_p3 }
  0x9e   : > { %p3636_p0 = pnand %p3635_p2, %p3629_p7 }
  0xa0   : > { %3639 = shalt.err (!%p3636_p0)
}
  0xa1   : > { %3003 = dma.hbm_to_vmem [thread:$0]  (!%p4444_p10), %s4404_s2, 32, %s252_s5, [#allocation6]  }
  0xa2   : > { %s3790_s22 = smov [#allocation10]   ;;  %s4445_s15 = sand.u32 1, %s3772_s26  }
  0xa3   : > { %s275_s3 = sshll.u32 %s3790_s22, 4  ;;  %s2964_s8 = smul.u32 6, %s4445_s15  ;;  %s276_s3 = int_to_ptr.vmem [resolvable:$true] %s275_s3 }
  0xa4   : > { %s2943_s16 = smul.u32 96, %s3776_s27  ;;  %s3640_s18 = scalar_lea.hbm %s4406_s4, 64 }
  0xa5   : > { %p3641_p0 = scmp.ne.s32.totalorder %s4406_s4, %s3640_s18  ;;  %p3647_p4 = scmp.lt.u32.totalorder %s3640_s18, %s4406_s4 }
  0xa7   : > { %p3643_p8 = pnand %p3641_p0, %p3896_p12 }
  0xa9   : > { %p3644_p9 = pneg %p3643_p8 }
  0xab   : > { %p3649_p5 = pnand %p3647_p4, %p3644_p9 }
  0xad   : > { %3652 = shalt.err (!%p3649_p5)
}
  0xae   : > { %s3653_s5 = scalar_lea.vmem %s276_s3, 64  ;;  %p3661_p7 = scmp.lt.s32.totalorder %s276_s3, %s276_s3 }
  0xaf   : > { %p3654_p6 = scmp.ne.s32.totalorder %s276_s3, %s3653_s5  ;;  %p3662_p11 = scmp.lt.s32.totalorder %s3653_s5, %s3653_s5 }
  0xb1   : > { %p3656_p13 = pnand %p3654_p6, %p3896_p12  ;;  %p3663_p1 = por %p3662_p11, %p3661_p7 }
  0xb3   : > { %p3657_p3 = pneg %p3656_p13 }
  0xb5   : > { %p3664_p2 = pnand %p3663_p1, %p3657_p3 }
  0xb7   : > { %3667 = shalt.err (!%p3664_p2)
}
  0xb8   : > { %3009 = dma.hbm_to_vmem [thread:$0]  (!%p4444_p10), %s4406_s4, 64, %s276_s3, [#allocation9]  }
  0xb9   : > { %s4058_s15 = scalar_lea.hbm %s4408_s6, %s2943_s16  ;;  %s311_s20 = scalar_lea.vmem [#allocation13], %s2964_s8 }
  0xba   : > { %s319_s7 = sshll.u32 %s311_s20, 4  ;;  %s3668_s24 = scalar_lea.hbm %s4058_s15, 96  ;;  %s320_s7 = int_to_ptr.vmem [resolvable:$true] %s319_s7 }
  0xbb   : > { %p3669_p12 = scmp.ne.s32.totalorder %s4058_s15, %s3668_s24  ;;  %p4446_p0 = scmp.ne.s32.totalorder %s4442_s11, 0 }
  0xbc   : > { %s3673_s18 = scalar_lea.hbm %s4408_s6, 384  ;;  %p3674_p10 = scmp.lt.u32.totalorder %s4058_s15, %s4408_s6 }
  0xbd   : > { %p4447_p8 = pneg %p4446_p0  ;;  %p3675_p5 = scmp.lt.u32.totalorder %s3673_s18, %s3668_s24 }
  0xbe   : > { %p3677_p13 = scmp.lt.u32.totalorder %s3668_s24, %s4058_s15 }
  0xbf   : > { %p3671_p9 = pnand %p3669_p12, %p4447_p8  ;;  %p3676_p6 = por %p3675_p5, %p3674_p10 }
  0xc1   : > { %p3672_p4 = pneg %p3671_p9  ;;  %p3678_p3 = por %p3677_p13, %p3676_p6 }
  0xc3   : > { %p3679_p7 = pnand %p3678_p3, %p3672_p4 }
  0xc5   : > { %3682 = shalt.err (!%p3679_p7)
}
  0xc6   : > { %s3683_s8 = scalar_lea.vmem %s320_s7, 96  ;;  %p4448_p1 = pmov %p4447_p8 }
  0xc7   : > { %p3684_p11 = scmp.ne.s32.totalorder %s320_s7, %s3683_s8  ;;  %s3791_s19 = smov [#allocation13]  }
  0xc8   : > { %s3688_s29 = sshll.u32 %s3791_s19, 4  ;;  %s3689_s29 = int_to_ptr.vmem [resolvable:$false] %s3688_s29 }
  0xc9   : > { %p3686_p2 = pnand %p3684_p11, %p4448_p1  ;;  %s3690_s10 = scalar_lea.vmem %s3689_s29, 192 }
  0xca   : > { %p3691_p8 = scmp.lt.s32.totalorder %s320_s7, %s3689_s29  ;;  %p3692_p9 = scmp.lt.s32.totalorder %s3690_s10, %s3683_s8 }
  0xcb   : > { %p3687_p12 = pneg %p3686_p2 }
  0xcc   : > { %p3693_p5 = por %p3692_p9, %p3691_p8 }
  0xce   : > { %p3694_p10 = pnand %p3693_p5, %p3687_p12 }
  0xd0   : > { %3697 = shalt.err (!%p3694_p10)
}
  0xd1   : > { %3016 = dma.hbm_to_vmem [thread:$0]  (!%p4446_p0), %s4058_s15, 96, %s320_s7, %s3970_s23  }
  0xd2   : > { %p4449_p4 = scmp.ne.s32.totalorder %s4433_s9, 0 }
  0xd3   : > { %p4450_p6 = scmp.eq.s32.totalorder (!%p4449_p4), %s3855_s28, 0 }
  0xd4   : > { %328 = sbr.rel (%p4449_p4) target bundleno = 1136 (0x470), region = 48 }
  0xdb   : > { %3743 = dma.done.wait (%p4450_p6), [#allocation3], 128   ;;  %p4451_p13 = pmov %p4450_p6 }
  0xdc   : > { %p4452_p3 = pmov %p4450_p6 }
  0xdd   : > { %3745 = vsyncadd (%p4451_p13), [#allocation3], 4294967168 }
  0xde   : > { %3747 = dma.done.wait (%p4452_p3), [#allocation6], 2080   ;;  %p4453_p7 = pmov %p4452_p3 }
  0xdf   : > { %p4454_p11 = pmov %p4452_p3 }
  0xe0   : > { %3749 = vsyncadd (%p4453_p7), [#allocation6], 4294965216 }
  0xe1   : > { %3751 = dma.done.wait (%p4454_p11), [#allocation9], 8256   ;;  %p4455_p0 = pmov %p4452_p3 }
  0xe2   : > { %s350_s9 = sand.u32 1, %s3855_s28   ;;  %s4096_s23 = sand.u32 1, %s3768_s25  }
  0xe3   : > { %3753 = vsyncadd (%p4455_p0), [#allocation9], 4294959040  ;;  %s2965_s11 = smul.u32 1536, %s4096_s23  ;;  %s351_s5 = scalar_lea.sflag [#allocation12], %s350_s9 }
  0xe4   : > { %p4456_p1 = scmp.ne.s32.totalorder %s4430_s30, 0 }
  0xe5   : > { %s4099_s14 = scalar_lea.vmem [#allocation11], %s2965_s11 }
  0xe6   : > { %3755 = dma.done.wait (%p4456_p1), %s351_s5, 24672  }
  0xe7   : > { %3757 = vsyncadd (%p4456_p1), %s351_s5, 4294942624  ;;  %v3792_v0 = vmov 0   ;;  %v3078_v1 = vld [vmem:[#allocation5 + $0x4] ss:$8 sps:$4 sm:$0xff]   ;;  %v3080_v2 = vld [vmem:[#allocation5] ss:$8 sps:$4 sm:$0xff]  }
  0xe8   : > { %545 = vmatprep.mubr.bf16.mxu0 %v3792_v0  ;;  %513 = vmatprep.subr.bf16.mxu0 %v3078_v1  ;;  %v3081_v3 = vld [vmem:[#allocation5 + $0x14] ss:$8 sps:$4 sm:$0xff]   ;;  %v3083_v4 = vld [vmem:[#allocation5 + $0x10] ss:$8 sps:$4 sm:$0xff]   ;;  %v3084_v5 = vld [vmem:[#allocation5 + $0x24] ss:$8 sps:$4 sm:$0xff]  }
  0xe9   : > { %514 = vmatpush1.bf16.msra.mxu0 %v3080_v2  ;;  %v3086_v6 = vld [vmem:[#allocation5 + $0x20] ss:$8 sps:$4 sm:$0xff]   ;;  %v3087_v7 = vld [vmem:[#allocation5 + $0x34] ss:$8 sps:$4 sm:$0xff]   ;;  %v3089_v8 = vld [vmem:[#allocation5 + $0x30] ss:$8 sps:$4 sm:$0xff]  }
  0xea   : > { %515 = vmatprep.subr.bf16.mxu0 %v3081_v3  ;;  %v3090_v9 = vld [vmem:[#allocation5 + $0x44] ss:$8 sps:$4 sm:$0xff]   ;;  %v3092_v10 = vld [vmem:[#allocation5 + $0x40] ss:$8 sps:$4 sm:$0xff]   ;;  %v3093_v11 = vld [vmem:[#allocation5 + $0x54] ss:$8 sps:$4 sm:$0xff]  }
  0xeb   : > { %v3095_v12 = vld [vmem:[#allocation5 + $0x50] ss:$8 sps:$4 sm:$0xff]   ;;  %v3096_v13 = vld [vmem:[#allocation5 + $0x64] ss:$8 sps:$4 sm:$0xff]   ;;  %v3098_v14 = vld [vmem:[#allocation5 + $0x60] ss:$8 sps:$4 sm:$0xff]  }
  0xec   : > { %v3099_v15 = vld [vmem:[#allocation5 + $0x74] ss:$8 sps:$4 sm:$0xff]   ;;  %v3101_v16 = vld [vmem:[#allocation5 + $0x70] ss:$8 sps:$4 sm:$0xff]   ;;  %v3198_v52 = vld [vmem:[%s4099_s14 + $0x4] ss:$24 sps:$4 sm:$0xff]  }
  0xed   : > { %516 = vmatpush1.bf16.msra.mxu0 %v3083_v4  ;;  %v403_v17 = vld [vmem:[#allocation2] sm:$0xff]  ;;  %v3102_v19 = vld [vmem:[#allocation8] ss:$16 sps:$4 sm:$0xff]   ;;  %2238 = vmatprep.subr.bf16.mxu1 %v3198_v52  ;;  %s2966_s30 = smul.u32 6, %s4096_s23  ;;  %s4457_s12 = sld [smem:[#allocation27_spill]] }
  0xee   : > { %517 = vmatprep.subr.bf16.mxu0 %v3084_v5  ;;  %v3104_v18 = vld [vmem:[#allocation8 + $0x4] ss:$16 sps:$4 sm:$0xff]   ;;  %v404_v20 = vpack.c.bf16 %v403_v17, %v403_v17  ;;  %v3105_v22 = vld [vmem:[#allocation8 + $0x20] ss:$16 sps:$4 sm:$0xff]   ;;  %v3152_v51 = vld [vmem:[#allocation8 + $0xc] ss:$16 sps:$4 sm:$0xff]  }
  0xef   : > { %v3107_v21 = vld [vmem:[#allocation8 + $0x24] ss:$16 sps:$4 sm:$0xff]   ;;  %v3108_v24 = vld [vmem:[#allocation8 + $0x40] ss:$16 sps:$4 sm:$0xff]   ;;  %v421_v17 = vld [vmem:[#allocation7] sm:$0x3] }
  0xf0   : > { %v3110_v23 = vld [vmem:[#allocation8 + $0x44] ss:$16 sps:$4 sm:$0xff]   ;;  %v3111_v26 = vld [vmem:[#allocation8 + $0x60] ss:$16 sps:$4 sm:$0xff]   ;;  %v3182_v52 = vld [vmem:[#allocation8 + $0x14c] ss:$16 sps:$4 sm:$0xff]  }
  0xf1   : > { %518 = vmatpush1.bf16.msra.mxu0 %v3086_v6  ;;  %v3113_v25 = vld [vmem:[#allocation8 + $0x64] ss:$16 sps:$4 sm:$0xff]   ;;  %v3114_v28 = vld [vmem:[#allocation8 + $0x80] ss:$16 sps:$4 sm:$0xff]   ;;  %s363_s13 = scalar_lea.vmem [#allocation13], %s2966_s30  ;;  %s2967_s17 = smul.u32 48, %s4096_s23 }
  0xf2   : > { %519 = vmatprep.subr.bf16.mxu0 %v3087_v7  ;;  %v3116_v27 = vld [vmem:[#allocation8 + $0x84] ss:$16 sps:$4 sm:$0xff]   ;;  %v3117_v30 = vld [vmem:[#allocation8 + $0xa0] ss:$16 sps:$4 sm:$0xff]   ;;  %s2944_s15 = smul.u32 768, %s3855_s28  ;;  %s2497_s18 = scalar_lea.sflag [#allocation4], %s4096_s23 }
  0xf3   : > { %v3119_v29 = vld [vmem:[#allocation8 + $0xa4] ss:$16 sps:$4 sm:$0xff]   ;;  %v3120_v32 = vld [vmem:[#allocation8 + $0xc0] ss:$16 sps:$4 sm:$0xff]   ;;  %s398_s22 = scalar_lea.vmem [#allocation14], %s2967_s17  ;;  %p4458_p12 = scmp.ne.s32.totalorder %s4441_s21, 0 }
  0xf4   : > { %v3122_v31 = vld [vmem:[#allocation8 + $0xc4] ss:$16 sps:$4 sm:$0xff]   ;;  %v3123_v34 = vld [vmem:[#allocation8 + $0xe0] ss:$16 sps:$4 sm:$0xff]   ;;  %s2511_s20 = sshll.u32 %s398_s22, 4  ;;  %s4359_s3 = scalar_lea.hbm %s4457_s12, %s2944_s15  ;;  %s4361_s20 = int_to_ptr.vmem [resolvable:$true] %s2511_s20 }
  0xf5   : > { %520 = vmatpush1.bf16.msra.mxu0 %v3089_v8  ;;  %v3125_v33 = vld [vmem:[#allocation8 + $0xe4] ss:$16 sps:$4 sm:$0xff]   ;;  %v3126_v36 = vld [vmem:[#allocation8 + $0x100] ss:$16 sps:$4 sm:$0xff]   ;;  %s3698_s1 = scalar_lea.vmem %s4361_s20, 768  ;;  %s3793_s28 = smov [#allocation14]  }
  0xf6   : > { %521 = vmatprep.subr.bf16.mxu0 %v3090_v9  ;;  %v3128_v35 = vld [vmem:[#allocation8 + $0x104] ss:$16 sps:$4 sm:$0xff]   ;;  %v3129_v38 = vld [vmem:[#allocation8 + $0x120] ss:$16 sps:$4 sm:$0xff]   ;;  %p3699_p2 = scmp.ne.s32.totalorder %s4361_s20, %s3698_s1  ;;  %s3702_s16 = sshll.u32 %s3793_s28, 4  ;;  %s3703_s16 = int_to_ptr.vmem [resolvable:$false] %s3702_s16 }
  0xf7   : > { %v3131_v37 = vld [vmem:[#allocation8 + $0x124] ss:$16 sps:$4 sm:$0xff]   ;;  %v3132_v40 = vld [vmem:[#allocation8 + $0x140] ss:$16 sps:$4 sm:$0xff]   ;;  %s3704_s8 = scalar_lea.vmem %s3703_s16, 1536  ;;  %p3705_p5 = scmp.lt.s32.totalorder %s4361_s20, %s3703_s16 }
  0xf8   : > { %v3134_v39 = vld [vmem:[#allocation8 + $0x144] ss:$16 sps:$4 sm:$0xff]   ;;  %v3135_v42 = vld [vmem:[#allocation8 + $0x160] ss:$16 sps:$4 sm:$0xff]   ;;  %p3700_p8 = pnand %p3699_p2, %p4458_p12  ;;  %p3706_p10 = scmp.lt.s32.totalorder %s3704_s8, %s3698_s1 }
  0xf9   : > { %522 = vmatpush1.bf16.msra.mxu0 %v3092_v10  ;;  %v3137_v41 = vld [vmem:[#allocation8 + $0x164] ss:$16 sps:$4 sm:$0xff]   ;;  %v3138_v44 = vld [vmem:[#allocation8 + $0x180] ss:$16 sps:$4 sm:$0xff]   ;;  %v423_v10 = vlaneseq }
  0xfa   : > { %523 = vmatprep.subr.bf16.mxu0 %v3093_v11  ;;  %v3140_v43 = vld [vmem:[#allocation8 + $0x184] ss:$16 sps:$4 sm:$0xff]   ;;  %v3141_v46 = vld [vmem:[#allocation8 + $0x1a0] ss:$16 sps:$4 sm:$0xff]   ;;  %p3701_p9 = pneg %p3700_p8  ;;  %p3707_p4 = por %p3706_p10, %p3705_p5 }
  0xfb   : > { %v3143_v45 = vld [vmem:[#allocation8 + $0x1a4] ss:$16 sps:$4 sm:$0xff]   ;;  %v3144_v48 = vld [vmem:[#allocation8 + $0x1c0] ss:$16 sps:$4 sm:$0xff]  }
  0xfc   : > { %v3146_v47 = vld [vmem:[#allocation8 + $0x1c4] ss:$16 sps:$4 sm:$0xff]   ;;  %v3147_v50 = vld [vmem:[#allocation8 + $0x1e0] ss:$16 sps:$4 sm:$0xff]   ;;  %p3708_p6 = pnand %p3707_p4, %p3701_p9 }
  0xfd   : > { %524 = vmatpush1.bf16.msra.mxu0 %v3095_v12  ;;  %v3149_v49 = vld [vmem:[#allocation8 + $0x1e4] ss:$16 sps:$4 sm:$0xff]   ;;  %v3204_v54 = vld [vmem:[%s4099_s14 + $0x34] ss:$24 sps:$4 sm:$0xff]   ;;  %v3210_v56 = vld [vmem:[%s4099_s14 + $0x64] ss:$24 sps:$4 sm:$0xff]  }
  0xfe   : > { %525 = vmatprep.subr.bf16.mxu0 %v3096_v13  ;;  %v3203_v53 = vld [vmem:[%s4099_s14] ss:$24 sps:$4 sm:$0xff]   ;;  %v3209_v55 = vld [vmem:[%s4099_s14 + $0x30] ss:$24 sps:$4 sm:$0xff]   ;;  %v3216_v58 = vld [vmem:[%s4099_s14 + $0x94] ss:$24 sps:$4 sm:$0xff]  }
  0xff   : > { %2239 = vmatpush1.bf16.msra.mxu1 %v3203_v53  ;;  %v3215_v57 = vld [vmem:[%s4099_s14 + $0x60] ss:$24 sps:$4 sm:$0xff]   ;;  %v3221_v59 = vld [vmem:[%s4099_s14 + $0x90] ss:$24 sps:$4 sm:$0xff]   ;;  %v3222_v60 = vld [vmem:[%s4099_s14 + $0xc4] ss:$24 sps:$4 sm:$0xff]  }
 0x100   : > { %2240 = vmatprep.subr.bf16.mxu1 %v3204_v54  ;;  %v3227_v61 = vld [vmem:[%s4099_s14 + $0xc0] ss:$24 sps:$4 sm:$0xff]   ;;  %v3228_v62 = vld [vmem:[%s4099_s14 + $0xf4] ss:$24 sps:$4 sm:$0xff]   ;;  %v3233_v63 = vld [vmem:[%s4099_s14 + $0xf0] ss:$24 sps:$4 sm:$0xff]  }
 0x101   : > { %526 = vmatpush1.bf16.msra.mxu0 %v3098_v14  ;;  %v3234_v0 = vld [vmem:[%s4099_s14 + $0x124] ss:$24 sps:$4 sm:$0xff]   ;;  %v3239_v1 = vld [vmem:[%s4099_s14 + $0x120] ss:$24 sps:$4 sm:$0xff]   ;;  %v3240_v2 = vld [vmem:[%s4099_s14 + $0x154] ss:$24 sps:$4 sm:$0xff]  }
 0x102   : > { %527 = vmatprep.subr.bf16.mxu0 %v3099_v15  ;;  %v3245_v3 = vld [vmem:[%s4099_s14 + $0x150] ss:$24 sps:$4 sm:$0xff]   ;;  %v3246_v4 = vld [vmem:[%s4099_s14 + $0x184] ss:$24 sps:$4 sm:$0xff]   ;;  %v3251_v5 = vld [vmem:[%s4099_s14 + $0x180] ss:$24 sps:$4 sm:$0xff]  }
 0x103   : > { %2241 = vmatpush1.bf16.msra.mxu1 %v3209_v55  ;;  %v3252_v6 = vld [vmem:[%s4099_s14 + $0x1b4] ss:$24 sps:$4 sm:$0xff]   ;;  %v3257_v7 = vld [vmem:[%s4099_s14 + $0x1b0] ss:$24 sps:$4 sm:$0xff]   ;;  %v3258_v8 = vld [vmem:[%s4099_s14 + $0x1e4] ss:$24 sps:$4 sm:$0xff]  }
 0x104   : > { %2242 = vmatprep.subr.bf16.mxu1 %v3210_v56  ;;  %v3263_v9 = vld [vmem:[%s4099_s14 + $0x1e0] ss:$24 sps:$4 sm:$0xff]   ;;  %v3264_v11 = vld [vmem:[%s4099_s14 + $0x214] ss:$24 sps:$4 sm:$0xff]   ;;  %v3269_v12 = vld [vmem:[%s4099_s14 + $0x210] ss:$24 sps:$4 sm:$0xff]  }
 0x105   : > { %528 = vmatpush1.bf16.msra.mxu0 %v3101_v16  ;;  %v4129_v13 = vshrl.u32 %v423_v10, 7  ;;  %v3270_v14 = vld [vmem:[%s4099_s14 + $0x244] ss:$24 sps:$4 sm:$0xff]   ;;  %v3275_v15 = vld [vmem:[%s4099_s14 + $0x240] ss:$24 sps:$4 sm:$0xff]  }
 0x106   : > { %964 = vmatprep.subr.bf16.mxu0 %v3104_v18  ;;  %v3180_v53 = vld [vmem:[#allocation8 + $0x148] ss:$16 sps:$4 sm:$0xff]   ;;  %v3185_v54 = vld [vmem:[#allocation8 + $0x16c] ss:$16 sps:$4 sm:$0xff]  }
 0x107   : > { %2243 = vmatpush1.bf16.msra.mxu1 %v3215_v57  ;;  %v4134_v16 = vsub.s32 0, %v4129_v13  ;;  %v4137_v18 = vsub.s32 1, %v4129_v13  ;;  %v3183_v55 = vld [vmem:[#allocation8 + $0x168] ss:$16 sps:$4 sm:$0xff]   ;;  %v3188_v56 = vld [vmem:[#allocation8 + $0x18c] ss:$16 sps:$4 sm:$0xff]  }
 0x108   : > { %546 = vmatmul.mubr.bf16.vlgmr.msra.gmra.mrb[0].mxu0 %v404_v20  ;;  %2244 = vmatprep.subr.bf16.mxu1 %v3216_v58  ;;  %v3281_v20 = vld [vmem:[%s4099_s14 + $0x270] ss:$24 sps:$4 sm:$0xff]   ;;  %v3186_v57 = vld [vmem:[#allocation8 + $0x188] ss:$16 sps:$4 sm:$0xff]  }
 0x109   : > { %965 = vmatpush1.bf16.msra.mxu0 %v3102_v19  ;;  %v3276_v19 = vld [vmem:[%s4099_s14 + $0x274] ss:$24 sps:$4 sm:$0xff]   ;;  %v3191_v58 = vld [vmem:[#allocation8 + $0x1ac] ss:$16 sps:$4 sm:$0xff]  }
 0x10a   : > { %966 = vmatprep.subr.bf16.mxu0 %v3107_v21  ;;  %v426_v21 = vrot.slane %v421_v17, %v4134_v16  ;;  %v3232_v10 = vld [vmem:[%s4099_s14 + $0xfc] ss:$24 sps:$4 sm:$0xff]  }
 0x10b   : > { %2245 = vmatpush1.bf16.msra.mxu1 %v3221_v59  ;;  %v3189_v59 = vld [vmem:[#allocation8 + $0x1a8] ss:$16 sps:$4 sm:$0xff]  }
 0x10c   : > { %2246 = vmatprep.subr.bf16.mxu1 %v3222_v60  ;;  %v3194_v60 = vld [vmem:[#allocation8 + $0x1cc] ss:$16 sps:$4 sm:$0xff]  }
 0x10d   : > { %967 = vmatpush1.bf16.msra.mxu0 %v3105_v22  ;;  %v430_v22 = vrot.slane %v421_v17, %v4137_v18  ;;  %v3236_v17 = vld [vmem:[%s4099_s14 + $0x128] ss:$24 sps:$4 sm:$0xff]  }
 0x10e   : > { %968 = vmatprep.subr.bf16.mxu0 %v3110_v23 }
 0x10f   : > { %2247 = vmatpush1.bf16.msra.mxu1 %v3227_v61  ;;  %v3192_v61 = vld [vmem:[#allocation8 + $0x1c8] ss:$16 sps:$4 sm:$0xff]  }
 0x110   : > { %2248 = vmatprep.subr.bf16.mxu1 %v3228_v62  ;;  %v3197_v62 = vld [vmem:[#allocation8 + $0x1ec] ss:$16 sps:$4 sm:$0xff]  }
 0x111   : > { %969 = vmatpush1.bf16.msra.mxu0 %v3108_v24 }
 0x112   : > { %970 = vmatprep.subr.bf16.mxu0 %v3113_v25 }
 0x113   : > { %2249 = vmatpush1.bf16.msra.mxu1 %v3233_v63  ;;  %v3195_v63 = vld [vmem:[#allocation8 + $0x1e8] ss:$16 sps:$4 sm:$0xff]  }
 0x114   : > { %2250 = vmatprep.subr.bf16.mxu1 %v3234_v0  ;;  %v3202_v0 = vld [vmem:[%s4099_s14 + $0xc] ss:$24 sps:$4 sm:$0xff]  }
 0x115   : > { %971 = vmatpush1.bf16.msra.mxu0 %v3111_v26 }
 0x116   : > { %972 = vmatprep.subr.bf16.mxu0 %v3116_v27 }
 0x117   : > { %2251 = vmatpush1.bf16.msra.mxu1 %v3239_v1  ;;  %v3200_v1 = vld [vmem:[%s4099_s14 + $0x8] ss:$24 sps:$4 sm:$0xff]  }
 0x118   : > { %2252 = vmatprep.subr.bf16.mxu1 %v3240_v2  ;;  %v3208_v2 = vld [vmem:[%s4099_s14 + $0x3c] ss:$24 sps:$4 sm:$0xff]  }
 0x119   : > { %973 = vmatpush1.bf16.msra.mxu0 %v3114_v28 }
 0x11a   : > { %974 = vmatprep.subr.bf16.mxu0 %v3119_v29 }
 0x11b   : > { %2253 = vmatpush1.bf16.msra.mxu1 %v3245_v3  ;;  %v3206_v3 = vld [vmem:[%s4099_s14 + $0x38] ss:$24 sps:$4 sm:$0xff]  }
 0x11c   : > { %2254 = vmatprep.subr.bf16.mxu1 %v3246_v4  ;;  %v3214_v4 = vld [vmem:[%s4099_s14 + $0x6c] ss:$24 sps:$4 sm:$0xff]  }
 0x11d   : > { %975 = vmatpush1.bf16.msra.mxu0 %v3117_v30 }
 0x11e   : > { %976 = vmatprep.subr.bf16.mxu0 %v3122_v31 }
 0x11f   : > { %2255 = vmatpush1.bf16.msra.mxu1 %v3251_v5  ;;  %v3212_v5 = vld [vmem:[%s4099_s14 + $0x68] ss:$24 sps:$4 sm:$0xff]  }
 0x120   : > { %2256 = vmatprep.subr.bf16.mxu1 %v3252_v6  ;;  %v3220_v6 = vld [vmem:[%s4099_s14 + $0x9c] ss:$24 sps:$4 sm:$0xff]  }
 0x121   : > { %977 = vmatpush1.bf16.msra.mxu0 %v3120_v32  ;;  %v3150_v32 = vld [vmem:[#allocation8 + $0x8] ss:$16 sps:$4 sm:$0xff]  }
 0x122   : > { %978 = vmatprep.subr.bf16.mxu0 %v3125_v33 }
 0x123   : > { %2257 = vmatpush1.bf16.msra.mxu1 %v3257_v7  ;;  %v3218_v7 = vld [vmem:[%s4099_s14 + $0x98] ss:$24 sps:$4 sm:$0xff]  }
 0x124   : > { %2258 = vmatprep.subr.bf16.mxu1 %v3258_v8  ;;  %v3226_v8 = vld [vmem:[%s4099_s14 + $0xcc] ss:$24 sps:$4 sm:$0xff]  }
 0x125   : > { %979 = vmatpush1.bf16.msra.mxu0 %v3123_v34  ;;  %v3155_v34 = vld [vmem:[#allocation8 + $0x2c] ss:$16 sps:$4 sm:$0xff]  }
 0x126   : > { %980 = vmatprep.subr.bf16.mxu0 %v3128_v35  ;;  %v3153_v35 = vld [vmem:[#allocation8 + $0x28] ss:$16 sps:$4 sm:$0xff]  }
 0x127   : > { %2259 = vmatpush1.bf16.msra.mxu1 %v3263_v9  ;;  %v3224_v9 = vld [vmem:[%s4099_s14 + $0xc8] ss:$24 sps:$4 sm:$0xff]  }
 0x128   : > { %2260 = vmatprep.subr.bf16.mxu1 %v3264_v11  ;;  %v3230_v11 = vld [vmem:[%s4099_s14 + $0xf8] ss:$24 sps:$4 sm:$0xff]  }
 0x129   : > { %981 = vmatpush1.bf16.msra.mxu0 %v3126_v36  ;;  %v3158_v36 = vld [vmem:[#allocation8 + $0x4c] ss:$16 sps:$4 sm:$0xff]  }
 0x12a   : > { %982 = vmatprep.subr.bf16.mxu0 %v3131_v37  ;;  %v3156_v37 = vld [vmem:[#allocation8 + $0x48] ss:$16 sps:$4 sm:$0xff]  }
 0x12b   : > { %2261 = vmatpush1.bf16.msra.mxu1 %v3269_v12  ;;  %v3238_v12 = vld [vmem:[%s4099_s14 + $0x12c] ss:$24 sps:$4 sm:$0xff]  }
 0x12c   : > { %2262 = vmatprep.subr.bf16.mxu1 %v3270_v14  ;;  %v3282_v14 = vld [vmem:[%s4099_s14 + $0x2a4] ss:$24 sps:$4 sm:$0xff]  }
 0x12d   : > { %983 = vmatpush1.bf16.msra.mxu0 %v3129_v38  ;;  %v3161_v38 = vld [vmem:[#allocation8 + $0x6c] ss:$16 sps:$4 sm:$0xff]  }
 0x12e   : > { %984 = vmatprep.subr.bf16.mxu0 %v3134_v39  ;;  %v3159_v39 = vld [vmem:[#allocation8 + $0x68] ss:$16 sps:$4 sm:$0xff]  }
 0x12f   : > { %2263 = vmatpush1.bf16.msra.mxu1 %v3275_v15  ;;  %v3287_v15 = vld [vmem:[%s4099_s14 + $0x2a0] ss:$24 sps:$4 sm:$0xff]  }
 0x130   : > { %2264 = vmatprep.subr.bf16.mxu1 %v3276_v19  ;;  %v3244_v19 = vld [vmem:[%s4099_s14 + $0x15c] ss:$24 sps:$4 sm:$0xff]  }
 0x131   : > { %985 = vmatpush1.bf16.msra.mxu0 %v3132_v40  ;;  %v3164_v40 = vld [vmem:[#allocation8 + $0x8c] ss:$16 sps:$4 sm:$0xff]  }
 0x132   : > { %986 = vmatprep.subr.bf16.mxu0 %v3137_v41  ;;  %v3162_v41 = vld [vmem:[#allocation8 + $0x88] ss:$16 sps:$4 sm:$0xff]  }
 0x133   : > { %2265 = vmatpush1.bf16.msra.mxu1 %v3281_v20  ;;  %v3288_v20 = vld [vmem:[%s4099_s14 + $0x2d4] ss:$24 sps:$4 sm:$0xff]  }
 0x134   : > { %2266 = vmatprep.subr.bf16.mxu1 %v3282_v14  ;;  %v3335_v14 = vld [vmem:[%s4099_s14 + $0x42c] ss:$24 sps:$4 sm:$0xff]  }
 0x135   : > { %987 = vmatpush1.bf16.msra.mxu0 %v3135_v42  ;;  %v3167_v42 = vld [vmem:[#allocation8 + $0xac] ss:$16 sps:$4 sm:$0xff]  }
 0x136   : > { %988 = vmatprep.subr.bf16.mxu0 %v3140_v43  ;;  %v3165_v43 = vld [vmem:[#allocation8 + $0xa8] ss:$16 sps:$4 sm:$0xff]  }
 0x137   : > { %2267 = vmatpush1.bf16.msra.mxu1 %v3287_v15  ;;  %v3330_v15 = vld [vmem:[%s4099_s14 + $0x420] ss:$24 sps:$4 sm:$0xff]  }
 0x138   : > { %2268 = vmatprep.subr.bf16.mxu1 %v3288_v20  ;;  %v3341_v20 = vld [vmem:[%s4099_s14 + $0x45c] ss:$24 sps:$4 sm:$0xff]  }
 0x139   : > { %989 = vmatpush1.bf16.msra.mxu0 %v3138_v44  ;;  %v3170_v44 = vld [vmem:[#allocation8 + $0xcc] ss:$16 sps:$4 sm:$0xff]  }
 0x13a   : > { %990 = vmatprep.subr.bf16.mxu0 %v3143_v45  ;;  %v3168_v45 = vld [vmem:[#allocation8 + $0xc8] ss:$16 sps:$4 sm:$0xff]  }
 0x13d   : > { %991 = vmatpush1.bf16.msra.mxu0 %v3141_v46  ;;  %v3173_v46 = vld [vmem:[#allocation8 + $0xec] ss:$16 sps:$4 sm:$0xff]  }
 0x13e   : > { %992 = vmatprep.subr.bf16.mxu0 %v3146_v47  ;;  %v3171_v47 = vld [vmem:[#allocation8 + $0xe8] ss:$16 sps:$4 sm:$0xff]  }
 0x141   : > { %993 = vmatpush1.bf16.msra.mxu0 %v3144_v48  ;;  %v3176_v48 = vld [vmem:[#allocation8 + $0x10c] ss:$16 sps:$4 sm:$0xff]  }
 0x142   : > { %994 = vmatprep.subr.bf16.mxu0 %v3149_v49  ;;  %v3174_v49 = vld [vmem:[#allocation8 + $0x108] ss:$16 sps:$4 sm:$0xff]  }
 0x145   : > { %995 = vmatpush1.bf16.msra.mxu0 %v3147_v50  ;;  %v3179_v50 = vld [vmem:[#allocation8 + $0x12c] ss:$16 sps:$4 sm:$0xff]  }
 0x146   : > { %1005 = vmatprep.subr.bf16.mxu0 %v3152_v51  ;;  %v3177_v51 = vld [vmem:[#allocation8 + $0x128] ss:$16 sps:$4 sm:$0xff]  }
 0x1db   : > { %v547_v23 = vpop.f32.mrb[0].mxu0 }
 0x1dc   : > { %v548_v24 = vadd.f32 %v547_v23, %v426_v21  ;;  %v549_v25 = vpop.f32.mrb[1].mxu0  ;;  %v3293_v21 = vld [vmem:[%s4099_s14 + $0x2d0] ss:$24 sps:$4 sm:$0xff]   ;;  %v3250_v23 = vld [vmem:[%s4099_s14 + $0x18c] ss:$24 sps:$4 sm:$0xff]  }
 0x1dd   : > { %v550_v26 = vadd.f32 %v549_v25, %v430_v22  ;;  %v551_v27 = vpop.f32.mrb[2].mxu0  ;;  %v3242_v22 = vld [vmem:[%s4099_s14 + $0x158] ss:$24 sps:$4 sm:$0xff]   ;;  %2269 = vmatpush1.bf16.msra.mxu1 %v3293_v21  ;;  %v3248_v25 = vld [vmem:[%s4099_s14 + $0x188] ss:$24 sps:$4 sm:$0xff]  }
 0x1de   : > { %v554_v28 = vmax.f32 %v548_v24, 0.0  ;;  %v552_v29 = vpop.f32.mrb[3].mxu0  ;;  %v3296_v24 = vld [vmem:[%s4099_s14 + $0x304] ss:$24 sps:$4 sm:$0xff]   ;;  %v3254_v27 = vld [vmem:[%s4099_s14 + $0x1b8] ss:$24 sps:$4 sm:$0xff]  }
 0x1df   : > { %v555_v30 = vmax.f32 %v550_v26, 0.0  ;;  %2279 = vmatprep.subr.bf16.mxu1 %v3296_v24  ;;  %v3256_v26 = vld [vmem:[%s4099_s14 + $0x1bc] ss:$24 sps:$4 sm:$0xff]   ;;  %v3260_v29 = vld [vmem:[%s4099_s14 + $0x1e8] ss:$24 sps:$4 sm:$0xff]  }
 0x1e0   : > { %v4143_v33 = vpack.c.bf16 %v554_v28, %v554_v28  ;;  %v3262_v28 = vld [vmem:[%s4099_s14 + $0x1ec] ss:$24 sps:$4 sm:$0xff]   ;;  %v3336_v21 = vld [vmem:[%s4099_s14 + $0x450] ss:$24 sps:$4 sm:$0xff]  }
 0x1e1   : > { %v557_v31 = vpack.c.bf16 %v555_v30, %v555_v30  ;;  %v3268_v30 = vld [vmem:[%s4099_s14 + $0x21c] ss:$24 sps:$4 sm:$0xff]   ;;  %v3347_v24 = vld [vmem:[%s4099_s14 + $0x48c] ss:$24 sps:$4 sm:$0xff]  }
 0x1e3   : > { %996 = vmatprep.mubr.bf16.mxu0 %v557_v31 }
 0x1e4   : > { %997 = vmatmul.mubr.bf16.vlgmr.msra.gmra.mrb[4].mxu0 %v4143_v33 }
 0x1e5   : > { %1006 = vmatpush1.bf16.msra.mxu0 %v3150_v32  ;;  %1037 = vmatprep.mubr.bf16.mxu0 %v557_v31  ;;  %v3266_v31 = vld [vmem:[%s4099_s14 + $0x218] ss:$24 sps:$4 sm:$0xff]   ;;  %v3274_v32 = vld [vmem:[%s4099_s14 + $0x24c] ss:$24 sps:$4 sm:$0xff]  }
 0x1e6   : > { %1007 = vmatprep.subr.bf16.mxu0 %v3155_v34  ;;  %v3280_v34 = vld [vmem:[%s4099_s14 + $0x27c] ss:$24 sps:$4 sm:$0xff]  }
 0x1e9   : > { %1008 = vmatpush1.bf16.msra.mxu0 %v3153_v35  ;;  %v3278_v35 = vld [vmem:[%s4099_s14 + $0x278] ss:$24 sps:$4 sm:$0xff]  }
 0x1ea   : > { %1009 = vmatprep.subr.bf16.mxu0 %v3158_v36  ;;  %v3286_v36 = vld [vmem:[%s4099_s14 + $0x2ac] ss:$24 sps:$4 sm:$0xff]  }
 0x1ed   : > { %1010 = vmatpush1.bf16.msra.mxu0 %v3156_v37  ;;  %v3284_v37 = vld [vmem:[%s4099_s14 + $0x2a8] ss:$24 sps:$4 sm:$0xff]  }
 0x1ee   : > { %1011 = vmatprep.subr.bf16.mxu0 %v3161_v38  ;;  %v3292_v38 = vld [vmem:[%s4099_s14 + $0x2dc] ss:$24 sps:$4 sm:$0xff]  }
 0x1f1   : > { %1012 = vmatpush1.bf16.msra.mxu0 %v3159_v39  ;;  %v3290_v39 = vld [vmem:[%s4099_s14 + $0x2d8] ss:$24 sps:$4 sm:$0xff]  }
 0x1f2   : > { %1013 = vmatprep.subr.bf16.mxu0 %v3164_v40  ;;  %v3299_v40 = vld [vmem:[%s4099_s14 + $0x30c] ss:$24 sps:$4 sm:$0xff]  }
 0x1f5   : > { %1014 = vmatpush1.bf16.msra.mxu0 %v3162_v41  ;;  %v4185_v41 = vld [vmem:[#allocation10] sm:$0xf] }
 0x1f6   : > { %1015 = vmatprep.subr.bf16.mxu0 %v3167_v42  ;;  %v627_v42 = vrot.slane %v4185_v41, %v4134_v16 }
 0x1f9   : > { %1016 = vmatpush1.bf16.msra.mxu0 %v3165_v43  ;;  %v631_v43 = vrot.slane %v4185_v41, %v4137_v18 }
 0x1fa   : > { %1017 = vmatprep.subr.bf16.mxu0 %v3170_v44 }
 0x1fd   : > { %1018 = vmatpush1.bf16.msra.mxu0 %v3168_v45 }
 0x1fe   : > { %1019 = vmatprep.subr.bf16.mxu0 %v3173_v46 }
 0x201   : > { %1020 = vmatpush1.bf16.msra.mxu0 %v3171_v47 }
 0x202   : > { %1021 = vmatprep.subr.bf16.mxu0 %v3176_v48 }
 0x205   : > { %1022 = vmatpush1.bf16.msra.mxu0 %v3174_v49 }
 0x206   : > { %1023 = vmatprep.subr.bf16.mxu0 %v3179_v50 }
 0x209   : > { %1024 = vmatpush1.bf16.msra.mxu0 %v3177_v51 }
 0x20a   : > { %1025 = vmatprep.subr.bf16.mxu0 %v3182_v52 }
 0x20d   : > { %1026 = vmatpush1.bf16.msra.mxu0 %v3180_v53  ;;  %v3294_v53 = vld [vmem:[%s4099_s14 + $0x300] ss:$24 sps:$4 sm:$0xff]  }
 0x20e   : > { %1027 = vmatprep.subr.bf16.mxu0 %v3185_v54  ;;  %v3297_v54 = vld [vmem:[%s4099_s14 + $0x308] ss:$24 sps:$4 sm:$0xff]  }
 0x211   : > { %1028 = vmatpush1.bf16.msra.mxu0 %v3183_v55 }
 0x212   : > { %1029 = vmatprep.subr.bf16.mxu0 %v3188_v56  ;;  %v3302_v56 = vld [vmem:[%s4099_s14 + $0x334] ss:$24 sps:$4 sm:$0xff]  }
 0x215   : > { %1030 = vmatpush1.bf16.msra.mxu0 %v3186_v57  ;;  %v3305_v57 = vld [vmem:[%s4099_s14 + $0x33c] ss:$24 sps:$4 sm:$0xff]  }
 0x216   : > { %1031 = vmatprep.subr.bf16.mxu0 %v3191_v58  ;;  %v3300_v58 = vld [vmem:[%s4099_s14 + $0x330] ss:$24 sps:$4 sm:$0xff]  }
 0x219   : > { %1032 = vmatpush1.bf16.msra.mxu0 %v3189_v59  ;;  %v3303_v59 = vld [vmem:[%s4099_s14 + $0x338] ss:$24 sps:$4 sm:$0xff]  }
 0x21a   : > { %1033 = vmatprep.subr.bf16.mxu0 %v3194_v60  ;;  %v3308_v60 = vld [vmem:[%s4099_s14 + $0x364] ss:$24 sps:$4 sm:$0xff]  }
 0x21d   : > { %1034 = vmatpush1.bf16.msra.mxu0 %v3192_v61  ;;  %v3311_v61 = vld [vmem:[%s4099_s14 + $0x36c] ss:$24 sps:$4 sm:$0xff]  }
 0x21e   : > { %1035 = vmatprep.subr.bf16.mxu0 %v3197_v62  ;;  %v3306_v62 = vld [vmem:[%s4099_s14 + $0x360] ss:$24 sps:$4 sm:$0xff]  }
 0x221   : > { %1036 = vmatpush1.bf16.msra.mxu0 %v3195_v63  ;;  %v3309_v63 = vld [vmem:[%s4099_s14 + $0x368] ss:$24 sps:$4 sm:$0xff]  }
 0x222   : > { %2320 = vmatprep.subr.bf16.mxu0 %v3202_v0  ;;  %v3314_v0 = vld [vmem:[%s4099_s14 + $0x394] ss:$24 sps:$4 sm:$0xff]  }
 0x224   : > { %1038 = vmatmul.mubr.bf16.vlgmr.msra.gmra.mrb[8].mxu0 %v4143_v33  ;;  %v3272_v33 = vld [vmem:[%s4099_s14 + $0x248] ss:$24 sps:$4 sm:$0xff]  }
 0x225   : > { %2321 = vmatpush1.bf16.msra.mxu0 %v3200_v1  ;;  %v3317_v1 = vld [vmem:[%s4099_s14 + $0x39c] ss:$24 sps:$4 sm:$0xff]  }
 0x226   : > { %2322 = vmatprep.subr.bf16.mxu0 %v3208_v2  ;;  %v3312_v2 = vld [vmem:[%s4099_s14 + $0x390] ss:$24 sps:$4 sm:$0xff]  }
 0x229   : > { %2323 = vmatpush1.bf16.msra.mxu0 %v3206_v3  ;;  %v3315_v3 = vld [vmem:[%s4099_s14 + $0x398] ss:$24 sps:$4 sm:$0xff]  }
 0x22a   : > { %2324 = vmatprep.subr.bf16.mxu0 %v3214_v4  ;;  %v3320_v4 = vld [vmem:[%s4099_s14 + $0x3c4] ss:$24 sps:$4 sm:$0xff]  }
 0x22d   : > { %2325 = vmatpush1.bf16.msra.mxu0 %v3212_v5  ;;  %v3323_v5 = vld [vmem:[%s4099_s14 + $0x3cc] ss:$24 sps:$4 sm:$0xff]  }
 0x22e   : > { %2326 = vmatprep.subr.bf16.mxu0 %v3220_v6  ;;  %v3318_v6 = vld [vmem:[%s4099_s14 + $0x3c0] ss:$24 sps:$4 sm:$0xff]  }
 0x231   : > { %2327 = vmatpush1.bf16.msra.mxu0 %v3218_v7  ;;  %v3321_v7 = vld [vmem:[%s4099_s14 + $0x3c8] ss:$24 sps:$4 sm:$0xff]  }
 0x232   : > { %2328 = vmatprep.subr.bf16.mxu0 %v3226_v8  ;;  %v3326_v8 = vld [vmem:[%s4099_s14 + $0x3f4] ss:$24 sps:$4 sm:$0xff]  }
 0x235   : > { %2329 = vmatpush1.bf16.msra.mxu0 %v3224_v9  ;;  %v3329_v9 = vld [vmem:[%s4099_s14 + $0x3fc] ss:$24 sps:$4 sm:$0xff]  }
 0x236   : > { %2330 = vmatprep.subr.bf16.mxu0 %v3232_v10  ;;  %v3324_v10 = vld [vmem:[%s4099_s14 + $0x3f0] ss:$24 sps:$4 sm:$0xff]  }
 0x239   : > { %2331 = vmatpush1.bf16.msra.mxu0 %v3230_v11  ;;  %v3327_v11 = vld [vmem:[%s4099_s14 + $0x3f8] ss:$24 sps:$4 sm:$0xff]  }
 0x23a   : > { %2332 = vmatprep.subr.bf16.mxu0 %v3238_v12  ;;  %v3332_v12 = vld [vmem:[%s4099_s14 + $0x424] ss:$24 sps:$4 sm:$0xff]  }
 0x23d   : > { %2333 = vmatpush1.bf16.msra.mxu0 %v3236_v17  ;;  %v3333_v17 = vld [vmem:[%s4099_s14 + $0x428] ss:$24 sps:$4 sm:$0xff]  }
 0x23e   : > { %2334 = vmatprep.subr.bf16.mxu0 %v3244_v19  ;;  %v3338_v19 = vld [vmem:[%s4099_s14 + $0x454] ss:$24 sps:$4 sm:$0xff]  }
 0x241   : > { %2335 = vmatpush1.bf16.msra.mxu0 %v3242_v22  ;;  %v3339_v22 = vld [vmem:[%s4099_s14 + $0x458] ss:$24 sps:$4 sm:$0xff]  }
 0x242   : > { %2336 = vmatprep.subr.bf16.mxu0 %v3250_v23  ;;  %v3344_v23 = vld [vmem:[%s4099_s14 + $0x484] ss:$24 sps:$4 sm:$0xff]  }
 0x245   : > { %2337 = vmatpush1.bf16.msra.mxu0 %v3248_v25  ;;  %v3342_v25 = vld [vmem:[%s4099_s14 + $0x480] ss:$24 sps:$4 sm:$0xff]  }
 0x246   : > { %2338 = vmatprep.subr.bf16.mxu0 %v3256_v26  ;;  %v3345_v26 = vld [vmem:[%s4099_s14 + $0x488] ss:$24 sps:$4 sm:$0xff]  }
 0x249   : > { %2339 = vmatpush1.bf16.msra.mxu0 %v3254_v27  ;;  %v3350_v27 = vld [vmem:[%s4099_s14 + $0x4b4] ss:$24 sps:$4 sm:$0xff]  }
 0x24a   : > { %2340 = vmatprep.subr.bf16.mxu0 %v3262_v28  ;;  %v3353_v28 = vld [vmem:[%s4099_s14 + $0x4bc] ss:$24 sps:$4 sm:$0xff]  }
 0x24d   : > { %2341 = vmatpush1.bf16.msra.mxu0 %v3260_v29  ;;  %v3348_v29 = vld [vmem:[%s4099_s14 + $0x4b0] ss:$24 sps:$4 sm:$0xff]  }
 0x24e   : > { %2342 = vmatprep.subr.bf16.mxu0 %v3268_v30  ;;  %v3351_v30 = vld [vmem:[%s4099_s14 + $0x4b8] ss:$24 sps:$4 sm:$0xff]  }
 0x251   : > { %2343 = vmatpush1.bf16.msra.mxu0 %v3266_v31  ;;  %v3356_v31 = vld [vmem:[%s4099_s14 + $0x4e4] ss:$24 sps:$4 sm:$0xff]  }
 0x252   : > { %2344 = vmatprep.subr.bf16.mxu0 %v3274_v32  ;;  %v3359_v32 = vld [vmem:[%s4099_s14 + $0x4ec] ss:$24 sps:$4 sm:$0xff]  }
 0x255   : > { %2345 = vmatpush1.bf16.msra.mxu0 %v3272_v33  ;;  %v3354_v33 = vld [vmem:[%s4099_s14 + $0x4e0] ss:$24 sps:$4 sm:$0xff]  }
 0x256   : > { %2346 = vmatprep.subr.bf16.mxu0 %v3280_v34  ;;  %v3357_v34 = vld [vmem:[%s4099_s14 + $0x4e8] ss:$24 sps:$4 sm:$0xff]  }
 0x259   : > { %2347 = vmatpush1.bf16.msra.mxu0 %v3278_v35  ;;  %v3362_v35 = vld [vmem:[%s4099_s14 + $0x514] ss:$24 sps:$4 sm:$0xff]  }
 0x25a   : > { %2348 = vmatprep.subr.bf16.mxu0 %v3286_v36  ;;  %v3365_v36 = vld [vmem:[%s4099_s14 + $0x51c] ss:$24 sps:$4 sm:$0xff]  }
 0x25d   : > { %2349 = vmatpush1.bf16.msra.mxu0 %v3284_v37  ;;  %v3360_v37 = vld [vmem:[%s4099_s14 + $0x510] ss:$24 sps:$4 sm:$0xff]  }
 0x25e   : > { %2350 = vmatprep.subr.bf16.mxu0 %v3292_v38  ;;  %v3363_v38 = vld [vmem:[%s4099_s14 + $0x518] ss:$24 sps:$4 sm:$0xff]  }
 0x261   : > { %2351 = vmatpush1.bf16.msra.mxu0 %v3290_v39  ;;  %v3368_v39 = vld [vmem:[%s4099_s14 + $0x544] ss:$24 sps:$4 sm:$0xff]  }
 0x262   : > { %2361 = vmatprep.subr.bf16.mxu0 %v3299_v40  ;;  %v3371_v40 = vld [vmem:[%s4099_s14 + $0x54c] ss:$24 sps:$4 sm:$0xff]  }
 0x2b7   : > { %v998_v44 = vpop.f32.mrb[4].mxu0 }
 0x2b8   : > { %v999_v45 = vadd.f32 %v998_v44, %v627_v42  ;;  %v1000_v46 = vpop.f32.mrb[5].mxu0  ;;  %v3366_v42 = vld [vmem:[%s4099_s14 + $0x540] ss:$24 sps:$4 sm:$0xff]   ;;  %v3374_v44 = vld [vmem:[%s4099_s14 + $0x574] ss:$24 sps:$4 sm:$0xff]  }
 0x2b9   : > { %v1001_v47 = vadd.f32 %v1000_v46, %v631_v43  ;;  %v1002_v48 = vpop.f32.mrb[6].mxu0  ;;  %v3369_v43 = vld [vmem:[%s4099_s14 + $0x548] ss:$24 sps:$4 sm:$0xff]   ;;  %v634_v46 = vsub.s32 2, %v4129_v13 }
 0x2ba   : > { %v1046_v49 = vmax.f32 %v999_v45, 0.0  ;;  %v1003_v50 = vpop.f32.mrb[7].mxu0  ;;  %v3377_v45 = vld [vmem:[%s4099_s14 + $0x57c] ss:$24 sps:$4 sm:$0xff]   ;;  %v3375_v48 = vld [vmem:[%s4099_s14 + $0x578] ss:$24 sps:$4 sm:$0xff]  }
 0x2bb   : > { %v1047_v51 = vmax.f32 %v1001_v47, 0.0  ;;  %v3372_v47 = vld [vmem:[%s4099_s14 + $0x570] ss:$24 sps:$4 sm:$0xff]   ;;  %v3380_v50 = vld [vmem:[%s4099_s14 + $0x5a4] ss:$24 sps:$4 sm:$0xff]  }
 0x2bc   : > { %v4195_v55 = vpack.c.bf16 %v1046_v49, %v1046_v49  ;;  %v638_v49 = vsub.s32 3, %v4129_v13 }
 0x2bd   : > { %v4191_v52 = vpack.c.bf16 %v1047_v51, %v1047_v51  ;;  %v3383_v51 = vld [vmem:[%s4099_s14 + $0x5ac] ss:$24 sps:$4 sm:$0xff]  }
 0x2bf   : > { %2270 = vmatprep.mubr.bf16.mxu1 %v4191_v52  ;;  %2352 = vmatprep.mubr.bf16.mxu0 %v4191_v52 }
 0x2c0   : > { %2271 = vmatmul.mubr.bf16.vlgmr.msra.gmra.mrb[0].mxu1 %v4195_v55  ;;  %2353 = vmatmul.mubr.bf16.vlgmr.msra.gmra.mrb[12].mxu0 %v4195_v55 }
 0x2c1   : > { %2280 = vmatpush1.bf16.msra.mxu1 %v3294_v53  ;;  %2362 = vmatpush1.bf16.msra.mxu0 %v3297_v54  ;;  %v635_v53 = vrot.slane %v4185_v41, %v634_v46  ;;  %v639_v54 = vrot.slane %v4185_v41, %v638_v49 }
 0x2c2   : > { %2281 = vmatprep.subr.bf16.mxu1 %v3302_v56  ;;  %2363 = vmatprep.subr.bf16.mxu0 %v3305_v57  ;;  %v3378_v56 = vld [vmem:[%s4099_s14 + $0x5a0] ss:$24 sps:$4 sm:$0xff]  }
 0x2c3   : > { %v3381_v57 = vld [vmem:[%s4099_s14 + $0x5a8] ss:$24 sps:$4 sm:$0xff]  }
 0x2c5   : > { %2282 = vmatpush1.bf16.msra.mxu1 %v3300_v58  ;;  %2364 = vmatpush1.bf16.msra.mxu0 %v3303_v59  ;;  %v3386_v58 = vld [vmem:[%s4099_s14 + $0x5d4] ss:$24 sps:$4 sm:$0xff]  }
 0x2c6   : > { %2283 = vmatprep.subr.bf16.mxu1 %v3308_v60  ;;  %2365 = vmatprep.subr.bf16.mxu0 %v3311_v61  ;;  %v3389_v59 = vld [vmem:[%s4099_s14 + $0x5dc] ss:$24 sps:$4 sm:$0xff]  }
 0x2c9   : > { %2284 = vmatpush1.bf16.msra.mxu1 %v3306_v62  ;;  %2366 = vmatpush1.bf16.msra.mxu0 %v3309_v63 }
 0x2ca   : > { %2285 = vmatprep.subr.bf16.mxu1 %v3314_v0  ;;  %2367 = vmatprep.subr.bf16.mxu0 %v3317_v1  ;;  %v3384_v1 = vld [vmem:[%s4099_s14 + $0x5d0] ss:$24 sps:$4 sm:$0xff]  }
 0x2cd   : > { %2286 = vmatpush1.bf16.msra.mxu1 %v3312_v2  ;;  %2368 = vmatpush1.bf16.msra.mxu0 %v3315_v3  ;;  %v3387_v2 = vld [vmem:[%s4099_s14 + $0x5d8] ss:$24 sps:$4 sm:$0xff]  }
 0x2ce   : > { %2287 = vmatprep.subr.bf16.mxu1 %v3320_v4  ;;  %2369 = vmatprep.subr.bf16.mxu0 %v3323_v5  ;;  %v3392_v4 = vld [vmem:[%s4099_s14 + $0x14] ss:$24 sps:$4 sm:$0xff]  }
 0x2d1   : > { %2288 = vmatpush1.bf16.msra.mxu1 %v3318_v6  ;;  %2370 = vmatpush1.bf16.msra.mxu0 %v3321_v7  ;;  %v3390_v7 = vld [vmem:[%s4099_s14 + $0x10] ss:$24 sps:$4 sm:$0xff]  }
 0x2d2   : > { %2289 = vmatprep.subr.bf16.mxu1 %v3326_v8  ;;  %2371 = vmatprep.subr.bf16.mxu0 %v3329_v9  ;;  %v3395_v9 = vld [vmem:[%s4099_s14 + $0x44] ss:$24 sps:$4 sm:$0xff]  }
 0x2d5   : > { %2290 = vmatpush1.bf16.msra.mxu1 %v3324_v10  ;;  %2372 = vmatpush1.bf16.msra.mxu0 %v3327_v11  ;;  %v3393_v10 = vld [vmem:[%s4099_s14 + $0x40] ss:$24 sps:$4 sm:$0xff]   ;;  %v3398_v11 = vld [vmem:[%s4099_s14 + $0x74] ss:$24 sps:$4 sm:$0xff]  }
 0x2d6   : > { %2291 = vmatprep.subr.bf16.mxu1 %v3332_v12  ;;  %2373 = vmatprep.subr.bf16.mxu0 %v3335_v14  ;;  %v3396_v12 = vld [vmem:[%s4099_s14 + $0x70] ss:$24 sps:$4 sm:$0xff]   ;;  %v3401_v14 = vld [vmem:[%s4099_s14 + $0xa4] ss:$24 sps:$4 sm:$0xff]  }
 0x2d9   : > { %2292 = vmatpush1.bf16.msra.mxu1 %v3330_v15  ;;  %2374 = vmatpush1.bf16.msra.mxu0 %v3333_v17  ;;  %v3399_v15 = vld [vmem:[%s4099_s14 + $0xa0] ss:$24 sps:$4 sm:$0xff]   ;;  %v3404_v17 = vld [vmem:[%s4099_s14 + $0xd4] ss:$24 sps:$4 sm:$0xff]  }
 0x2da   : > { %2293 = vmatprep.subr.bf16.mxu1 %v3338_v19  ;;  %2375 = vmatprep.subr.bf16.mxu0 %v3341_v20  ;;  %v3402_v19 = vld [vmem:[%s4099_s14 + $0xd0] ss:$24 sps:$4 sm:$0xff]   ;;  %v3405_v20 = vld [vmem:[%s4099_s14 + $0x100] ss:$24 sps:$4 sm:$0xff]  }
 0x2dd   : > { %2294 = vmatpush1.bf16.msra.mxu1 %v3336_v21  ;;  %2376 = vmatpush1.bf16.msra.mxu0 %v3339_v22  ;;  %v3410_v21 = vld [vmem:[%s4099_s14 + $0x134] ss:$24 sps:$4 sm:$0xff]   ;;  %v3408_v22 = vld [vmem:[%s4099_s14 + $0x130] ss:$24 sps:$4 sm:$0xff]  }
 0x2de   : > { %2295 = vmatprep.subr.bf16.mxu1 %v3344_v23  ;;  %2377 = vmatprep.subr.bf16.mxu0 %v3347_v24  ;;  %v3413_v23 = vld [vmem:[%s4099_s14 + $0x164] ss:$24 sps:$4 sm:$0xff]   ;;  %v3411_v24 = vld [vmem:[%s4099_s14 + $0x160] ss:$24 sps:$4 sm:$0xff]  }
 0x2e1   : > { %2296 = vmatpush1.bf16.msra.mxu1 %v3342_v25  ;;  %2378 = vmatpush1.bf16.msra.mxu0 %v3345_v26  ;;  %v3416_v25 = vld [vmem:[%s4099_s14 + $0x194] ss:$24 sps:$4 sm:$0xff]   ;;  %v3414_v26 = vld [vmem:[%s4099_s14 + $0x190] ss:$24 sps:$4 sm:$0xff]  }
 0x2e2   : > { %2297 = vmatprep.subr.bf16.mxu1 %v3350_v27  ;;  %2379 = vmatprep.subr.bf16.mxu0 %v3353_v28  ;;  %v3419_v27 = vld [vmem:[%s4099_s14 + $0x1c4] ss:$24 sps:$4 sm:$0xff]   ;;  %v3417_v28 = vld [vmem:[%s4099_s14 + $0x1c0] ss:$24 sps:$4 sm:$0xff]  }
 0x2e5   : > { %2298 = vmatpush1.bf16.msra.mxu1 %v3348_v29  ;;  %2380 = vmatpush1.bf16.msra.mxu0 %v3351_v30  ;;  %v3422_v29 = vld [vmem:[%s4099_s14 + $0x1f4] ss:$24 sps:$4 sm:$0xff]   ;;  %v3420_v30 = vld [vmem:[%s4099_s14 + $0x1f0] ss:$24 sps:$4 sm:$0xff]  }
 0x2e6   : > { %2299 = vmatprep.subr.bf16.mxu1 %v3356_v31  ;;  %2381 = vmatprep.subr.bf16.mxu0 %v3359_v32  ;;  %v3425_v31 = vld [vmem:[%s4099_s14 + $0x224] ss:$24 sps:$4 sm:$0xff]   ;;  %v3423_v32 = vld [vmem:[%s4099_s14 + $0x220] ss:$24 sps:$4 sm:$0xff]  }
 0x2e9   : > { %2300 = vmatpush1.bf16.msra.mxu1 %v3354_v33  ;;  %2382 = vmatpush1.bf16.msra.mxu0 %v3357_v34  ;;  %v3428_v33 = vld [vmem:[%s4099_s14 + $0x254] ss:$24 sps:$4 sm:$0xff]   ;;  %v3426_v34 = vld [vmem:[%s4099_s14 + $0x250] ss:$24 sps:$4 sm:$0xff]  }
 0x2ea   : > { %2301 = vmatprep.subr.bf16.mxu1 %v3362_v35  ;;  %2383 = vmatprep.subr.bf16.mxu0 %v3365_v36  ;;  %v3431_v35 = vld [vmem:[%s4099_s14 + $0x284] ss:$24 sps:$4 sm:$0xff]   ;;  %v3429_v36 = vld [vmem:[%s4099_s14 + $0x280] ss:$24 sps:$4 sm:$0xff]  }
 0x2ed   : > { %2302 = vmatpush1.bf16.msra.mxu1 %v3360_v37  ;;  %2384 = vmatpush1.bf16.msra.mxu0 %v3363_v38  ;;  %v3434_v37 = vld [vmem:[%s4099_s14 + $0x2b4] ss:$24 sps:$4 sm:$0xff]   ;;  %v3432_v38 = vld [vmem:[%s4099_s14 + $0x2b0] ss:$24 sps:$4 sm:$0xff]  }
 0x2ee   : > { %2303 = vmatprep.subr.bf16.mxu1 %v3368_v39  ;;  %2385 = vmatprep.subr.bf16.mxu0 %v3371_v40  ;;  %v3437_v39 = vld [vmem:[%s4099_s14 + $0x2e4] ss:$24 sps:$4 sm:$0xff]   ;;  %v3435_v40 = vld [vmem:[%s4099_s14 + $0x2e0] ss:$24 sps:$4 sm:$0xff]  }
 0x2f1   : > { %2304 = vmatpush1.bf16.msra.mxu1 %v3366_v42  ;;  %2386 = vmatpush1.bf16.msra.mxu0 %v3369_v43  ;;  %v3440_v42 = vld [vmem:[%s4099_s14 + $0x314] ss:$24 sps:$4 sm:$0xff]   ;;  %v3438_v43 = vld [vmem:[%s4099_s14 + $0x310] ss:$24 sps:$4 sm:$0xff]  }
 0x2f2   : > { %2305 = vmatprep.subr.bf16.mxu1 %v3374_v44  ;;  %2387 = vmatprep.subr.bf16.mxu0 %v3377_v45  ;;  %v3443_v44 = vld [vmem:[%s4099_s14 + $0x344] ss:$24 sps:$4 sm:$0xff]   ;;  %v3441_v45 = vld [vmem:[%s4099_s14 + $0x340] ss:$24 sps:$4 sm:$0xff]  }
 0x2f5   : > { %2306 = vmatpush1.bf16.msra.mxu1 %v3372_v47  ;;  %2388 = vmatpush1.bf16.msra.mxu0 %v3375_v48  ;;  %v3446_v47 = vld [vmem:[%s4099_s14 + $0x374] ss:$24 sps:$4 sm:$0xff]   ;;  %v3444_v48 = vld [vmem:[%s4099_s14 + $0x370] ss:$24 sps:$4 sm:$0xff]  }
 0x2f6   : > { %2307 = vmatprep.subr.bf16.mxu1 %v3380_v50  ;;  %2389 = vmatprep.subr.bf16.mxu0 %v3383_v51  ;;  %v3449_v50 = vld [vmem:[%s4099_s14 + $0x3a4] ss:$24 sps:$4 sm:$0xff]   ;;  %v3447_v51 = vld [vmem:[%s4099_s14 + $0x3a0] ss:$24 sps:$4 sm:$0xff]  }
 0x2f7   : > { %v1039_v60 = vpop.f32.mrb[8].mxu0 }
 0x2f8   : > { %v1040_v61 = vadd.f32 %v1039_v60, %v635_v53  ;;  %v1041_v62 = vpop.f32.mrb[9].mxu0  ;;  %v3450_v53 = vld [vmem:[%s4099_s14 + $0x3d0] ss:$24 sps:$4 sm:$0xff]   ;;  %v3459_v60 = vld [vmem:[%s4099_s14 + $0x460] ss:$24 sps:$4 sm:$0xff]  }
 0x2f9   : > { %v1042_v63 = vadd.f32 %v1041_v62, %v639_v54  ;;  %v1043_v0 = vpop.f32.mrb[10].mxu0  ;;  %2308 = vmatpush1.bf16.msra.mxu1 %v3378_v56  ;;  %2390 = vmatpush1.bf16.msra.mxu0 %v3381_v57  ;;  %v3455_v54 = vld [vmem:[%s4099_s14 + $0x404] ss:$24 sps:$4 sm:$0xff]   ;;  %v3453_v56 = vld [vmem:[%s4099_s14 + $0x400] ss:$24 sps:$4 sm:$0xff]  }
 0x2fa   : > { %v1048_v3 = vmax.f32 %v1040_v61, 0.0  ;;  %v1044_v41 = vpop.f32.mrb[11].mxu0  ;;  %2309 = vmatprep.subr.bf16.mxu1 %v3386_v58  ;;  %2391 = vmatprep.subr.bf16.mxu0 %v3389_v59  ;;  %v3458_v57 = vld [vmem:[%s4099_s14 + $0x434] ss:$24 sps:$4 sm:$0xff]   ;;  %v3456_v58 = vld [vmem:[%s4099_s14 + $0x430] ss:$24 sps:$4 sm:$0xff]  }
 0x2fb   : > { %v1049_v5 = vmax.f32 %v1042_v63, 0.0  ;;  %v3461_v59 = vld [vmem:[%s4099_s14 + $0x464] ss:$24 sps:$4 sm:$0xff]   ;;  %v3464_v61 = vld [vmem:[%s4099_s14 + $0x494] ss:$24 sps:$4 sm:$0xff]  }
 0x2fc   : > { %v4273_v8 = vpack.c.bf16 %v1048_v3, %v1048_v3  ;;  %v3462_v62 = vld [vmem:[%s4099_s14 + $0x490] ss:$24 sps:$4 sm:$0xff]   ;;  %v3467_v63 = vld [vmem:[%s4099_s14 + $0x4c4] ss:$24 sps:$4 sm:$0xff]   ;;  %v3465_v0 = vld [vmem:[%s4099_s14 + $0x4c0] ss:$24 sps:$4 sm:$0xff]  }
 0x2fd   : > { %v4270_v6 = vpack.c.bf16 %v1049_v5, %v1049_v5  ;;  %2310 = vmatpush1.bf16.msra.mxu1 %v3384_v1  ;;  %2392 = vmatpush1.bf16.msra.mxu0 %v3387_v2  ;;  %v3470_v1 = vld [vmem:[%s4099_s14 + $0x4f4] ss:$24 sps:$4 sm:$0xff]   ;;  %v3468_v2 = vld [vmem:[%s4099_s14 + $0x4f0] ss:$24 sps:$4 sm:$0xff]   ;;  %v3473_v3 = vld [vmem:[%s4099_s14 + $0x524] ss:$24 sps:$4 sm:$0xff]  }
 0x2fe   : > { %2402 = vmatprep.subr.bf16.mxu1 %v3392_v4  ;;  %v3471_v41 = vld [vmem:[%s4099_s14 + $0x520] ss:$24 sps:$4 sm:$0xff]   ;;  %v3476_v4 = vld [vmem:[%s4099_s14 + $0x554] ss:$24 sps:$4 sm:$0xff]   ;;  %v3474_v5 = vld [vmem:[%s4099_s14 + $0x550] ss:$24 sps:$4 sm:$0xff]  }
 0x2ff   : > { %2311 = vmatprep.mubr.bf16.mxu1 %v4270_v6  ;;  %2393 = vmatprep.mubr.bf16.mxu0 %v4270_v6 }
 0x300   : > { %2312 = vmatmul.mubr.bf16.vlgmr.msra.gmra.mrb[0].mxu1 %v4273_v8  ;;  %2394 = vmatmul.mubr.bf16.vlgmr.msra.gmra.mrb[12].mxu0 %v4273_v8 }
 0x301   : > { %2403 = vmatpush1.bf16.msra.mxu1 %v3390_v7  ;;  %2434 = vmatprep.mubr.bf16.mxu1 %v4191_v52  ;;  %v3407_v52 = vld [vmem:[%s4099_s14 + $0x104] ss:$24 sps:$4 sm:$0xff]   ;;  %v3477_v7 = vld [vmem:[%s4099_s14 + $0x580] ss:$24 sps:$4 sm:$0xff]  }
 0x302   : > { %2404 = vmatprep.subr.bf16.mxu1 %v3395_v9  ;;  %v3482_v9 = vld [vmem:[%s4099_s14 + $0x5b4] ss:$24 sps:$4 sm:$0xff]  }
 0x305   : > { %2405 = vmatpush1.bf16.msra.mxu1 %v3393_v10  ;;  %v3480_v10 = vld [vmem:[%s4099_s14 + $0x5b0] ss:$24 sps:$4 sm:$0xff]  }
 0x306   : > { %2406 = vmatprep.subr.bf16.mxu1 %v3398_v11  ;;  %v3485_v11 = vld [vmem:[%s4099_s14 + $0x5e4] ss:$24 sps:$4 sm:$0xff]  }
 0x309   : > { %2407 = vmatpush1.bf16.msra.mxu1 %v3396_v12  ;;  %v3483_v12 = vld [vmem:[%s4099_s14 + $0x5e0] ss:$24 sps:$4 sm:$0xff]  }
 0x30a   : > { %2408 = vmatprep.subr.bf16.mxu1 %v3401_v14  ;;  %v1246_v14 = vld [vmem:[%s363_s13] sm:$0x3f] }
 0x30d   : > { %2409 = vmatpush1.bf16.msra.mxu1 %v3399_v15  ;;  %v1251_v15 = vrot.slane %v1246_v14, %v4134_v16 }
 0x30e   : > { %2410 = vmatprep.subr.bf16.mxu1 %v3404_v17  ;;  %v1259_v17 = vrot.slane %v1246_v14, %v634_v46 }
 0x311   : > { %2411 = vmatpush1.bf16.msra.mxu1 %v3402_v19  ;;  %v1255_v19 = vrot.slane %v1246_v14, %v4137_v18 }
 0x312   : > { %2412 = vmatprep.subr.bf16.mxu1 %v3407_v52  ;;  %v1263_v52 = vrot.slane %v1246_v14, %v638_v49 }
 0x315   : > { %2413 = vmatpush1.bf16.msra.mxu1 %v3405_v20 }
 0x316   : > { %2414 = vmatprep.subr.bf16.mxu1 %v3410_v21 }
 0x319   : > { %2415 = vmatpush1.bf16.msra.mxu1 %v3408_v22 }
 0x31a   : > { %2416 = vmatprep.subr.bf16.mxu1 %v3413_v23 }
 0x31d   : > { %2417 = vmatpush1.bf16.msra.mxu1 %v3411_v24 }
 0x31e   : > { %2418 = vmatprep.subr.bf16.mxu1 %v3416_v25 }
 0x321   : > { %2419 = vmatpush1.bf16.msra.mxu1 %v3414_v26 }
 0x322   : > { %2420 = vmatprep.subr.bf16.mxu1 %v3419_v27 }
 0x325   : > { %2421 = vmatpush1.bf16.msra.mxu1 %v3417_v28 }
 0x326   : > { %2422 = vmatprep.subr.bf16.mxu1 %v3422_v29 }
 0x329   : > { %2423 = vmatpush1.bf16.msra.mxu1 %v3420_v30 }
 0x32a   : > { %2424 = vmatprep.subr.bf16.mxu1 %v3425_v31  ;;  %v1266_v31 = vsub.s32 4, %v4129_v13 }
 0x32d   : > { %2425 = vmatpush1.bf16.msra.mxu1 %v3423_v32  ;;  %v1270_v32 = vsub.s32 5, %v4129_v13 }
 0x32e   : > { %2426 = vmatprep.subr.bf16.mxu1 %v3428_v33  ;;  %v1267_v33 = vrot.slane %v1246_v14, %v1266_v31 }
 0x331   : > { %2427 = vmatpush1.bf16.msra.mxu1 %v3426_v34  ;;  %v1271_v34 = vrot.slane %v1246_v14, %v1270_v32 }
 0x332   : > { %2428 = vmatprep.subr.bf16.mxu1 %v3431_v35 }
 0x335   : > { %2429 = vmatpush1.bf16.msra.mxu1 %v3429_v36 }
 0x336   : > { %2430 = vmatprep.subr.bf16.mxu1 %v3434_v37 }
 0x339   : > { %2431 = vmatpush1.bf16.msra.mxu1 %v3432_v38 }
 0x33a   : > { %2432 = vmatprep.subr.bf16.mxu1 %v3437_v39 }
 0x33d   : > { %2433 = vmatpush1.bf16.msra.mxu1 %v3435_v40 }
 0x33e   : > { %2443 = vmatprep.subr.bf16.mxu1 %v3440_v42 }
 0x340   : > { %2435 = vmatmul.mubr.bf16.vlgmr.msra.gmra.mrb[4].mxu1 %v4195_v55  ;;  %v3452_v55 = vld [vmem:[%s4099_s14 + $0x3d4] ss:$24 sps:$4 sm:$0xff]  }
 0x341   : > { %2444 = vmatpush1.bf16.msra.mxu1 %v3438_v43  ;;  %2475 = vmatprep.mubr.bf16.mxu1 %v4270_v6  ;;  %v3479_v6 = vld [vmem:[%s4099_s14 + $0x584] ss:$24 sps:$4 sm:$0xff]  }
 0x342   : > { %2445 = vmatprep.subr.bf16.mxu1 %v3443_v44 }
 0x345   : > { %2446 = vmatpush1.bf16.msra.mxu1 %v3441_v45 }
 0x346   : > { %2447 = vmatprep.subr.bf16.mxu1 %v3446_v47 }
 0x349   : > { %2448 = vmatpush1.bf16.msra.mxu1 %v3444_v48 }
 0x34a   : > { %2449 = vmatprep.subr.bf16.mxu1 %v3449_v50 }
 0x34d   : > { %2450 = vmatpush1.bf16.msra.mxu1 %v3447_v51 }
 0x34e   : > { %2451 = vmatprep.subr.bf16.mxu1 %v3452_v55 }
 0x351   : > { %2452 = vmatpush1.bf16.msra.mxu1 %v3450_v53 }
 0x352   : > { %2453 = vmatprep.subr.bf16.mxu1 %v3455_v54 }
 0x355   : > { %2454 = vmatpush1.bf16.msra.mxu1 %v3453_v56 }
 0x356   : > { %2455 = vmatprep.subr.bf16.mxu1 %v3458_v57 }
 0x359   : > { %2456 = vmatpush1.bf16.msra.mxu1 %v3456_v58 }
 0x35a   : > { %2457 = vmatprep.subr.bf16.mxu1 %v3461_v59 }
 0x35d   : > { %2458 = vmatpush1.bf16.msra.mxu1 %v3459_v60 }
 0x35e   : > { %2459 = vmatprep.subr.bf16.mxu1 %v3464_v61 }
 0x361   : > { %2460 = vmatpush1.bf16.msra.mxu1 %v3462_v62 }
 0x362   : > { %2461 = vmatprep.subr.bf16.mxu1 %v3467_v63 }
 0x365   : > { %2462 = vmatpush1.bf16.msra.mxu1 %v3465_v0 }
 0x366   : > { %2463 = vmatprep.subr.bf16.mxu1 %v3470_v1 }
 0x369   : > { %2464 = vmatpush1.bf16.msra.mxu1 %v3468_v2 }
 0x36a   : > { %2465 = vmatprep.subr.bf16.mxu1 %v3473_v3 }
 0x36d   : > { %2466 = vmatpush1.bf16.msra.mxu1 %v3471_v41 }
 0x36e   : > { %2467 = vmatprep.subr.bf16.mxu1 %v3476_v4 }
 0x371   : > { %2468 = vmatpush1.bf16.msra.mxu1 %v3474_v5 }
 0x372   : > { %2469 = vmatprep.subr.bf16.mxu1 %v3479_v6 }
 0x375   : > { %2470 = vmatpush1.bf16.msra.mxu1 %v3477_v7 }
 0x376   : > { %2471 = vmatprep.subr.bf16.mxu1 %v3482_v9 }
 0x379   : > { %2472 = vmatpush1.bf16.msra.mxu1 %v3480_v10 }
 0x37a   : > { %2473 = vmatprep.subr.bf16.mxu1 %v3485_v11 }
 0x37d   : > { %2474 = vmatpush1.bf16.msra.mxu1 %v3483_v12 }
 0x380   : > { %2476 = vmatmul.mubr.bf16.vlgmr.msra.gmra.mrb[4].mxu1 %v4273_v8 }
 0x3d3   : > { %v2313_v20 = vpop.f32.mrb[0].mxu1  ;;  %v2395_v21 = vpop.f32.mrb[12].mxu0 }
 0x3d4   : > { %v2945_v22 = vadd.f32 %v2313_v20, %v1251_v15  ;;  %v2947_v23 = vadd.f32 %v2395_v21, %v1259_v17  ;;  %v2315_v24 = vpop.f32.mrb[1].mxu1  ;;  %v2397_v8 = vpop.f32.mrb[13].mxu0 }
 0x3d5   : > { %v2946_v25 = vadd.f32 %v2315_v24, %v1255_v19  ;;  %v2948_v26 = vadd.f32 %v2397_v8, %v1263_v52  ;;  %v2317_v27 = vpop.f32.mrb[2].mxu1  ;;  %v2399_v28 = vpop.f32.mrb[14].mxu0 }
 0x3d6   : > { %3486 = vtanh.f32 %v2945_v22  ;;  %v2318_v16 = vpop.f32.mrb[3].mxu1  ;;  %v2400_v29 = vpop.f32.mrb[15].mxu0 }
 0x3d7   : > { %3488 = vtanh.f32 %v2947_v23 }
 0x3d8   : > { %3490 = vtanh.f32 %v2946_v25 }
 0x3d9   : > { %3492 = vtanh.f32 %v2948_v26 }
 0x3e0   : > { %v3487_v18 = vpop.eup %3486 }
 0x3e1   : > { %v3489_v46 = vpop.eup %3488  ;;  %2490 = vst [vmem:[%s398_s22] sm:$0xff] %v3487_v18 }
 0x3e2   : > { %v3491_v49 = vpop.eup %3490  ;;  %2492 = vst [vmem:[%s398_s22 + $0x10] sm:$0xff] %v3489_v46 }
 0x3e3   : > { %v3493_v30 = vpop.eup %3492  ;;  %2491 = vst [vmem:[%s398_s22 + $0x8] sm:$0xff] %v3491_v49 }
 0x3e4   : > { %2493 = vst [vmem:[%s398_s22 + $0x18] sm:$0xff] %v3493_v30 }
 0x453   : > { %v2477_v35 = vpop.f32.mrb[4].mxu1 }
 0x454   : > { %v2949_v36 = vadd.f32 %v2477_v35, %v1267_v33  ;;  %v2479_v37 = vpop.f32.mrb[5].mxu1 }
 0x455   : > { %v2950_v38 = vadd.f32 %v2479_v37, %v1271_v34  ;;  %v2481_v39 = vpop.f32.mrb[6].mxu1 }
 0x456   : > { %3494 = vtanh.f32 %v2949_v36  ;;  %v2482_v40 = vpop.f32.mrb[7].mxu1 }
 0x457   : > { %3496 = vtanh.f32 %v2950_v38 }
 0x460   : > { %v3495_v42 = vpop.eup %3494 }
 0x461   : > { %v3497_v13 = vpop.eup %3496  ;;  %2494 = vst [vmem:[%s398_s22 + $0x20] sm:$0xff] %v3495_v42 }
 0x462   : > { %2495 = vst [vmem:[%s398_s22 + $0x28] sm:$0xff] %v3497_v13 }
 0x463   : > { %3711 = shalt.err (!%p3708_p6)
}
 0x464   : > { %s3712_s19 = scalar_lea.hbm %s4359_s3, 768  ;;  %s3716_s9 = scalar_lea.hbm %s4457_s12, 3072 }
 0x465   : > { %p3713_p13 = scmp.ne.s32.totalorder %s4359_s3, %s3712_s19  ;;  %p3717_p11 = scmp.lt.u32.totalorder %s4359_s3, %s4457_s12 }
 0x466   : > { %p3718_p0 = scmp.lt.u32.totalorder %s3716_s9, %s3712_s19  ;;  %p3720_p2 = scmp.lt.u32.totalorder %s3712_s19, %s4359_s3 }
 0x467   : > { %p3714_p3 = pnand %p3713_p13, %p4458_p12 }
 0x468   : > { %p3719_p1 = por %p3718_p0, %p3717_p11 }
 0x469   : > { %p3715_p7 = pneg %p3714_p3 }
 0x46a   : > { %p3721_p8 = por %p3720_p2, %p3719_p1 }
 0x46c   : > { %p3722_p9 = pnand %p3721_p8, %p3715_p7 }
 0x46e   : > { %3725 = shalt.err (!%p3722_p9)
}
 0x46f   : > { %2992 = dma.vmem_to_hbm [thread:$0]  (%p4458_p12), %s4361_s20, 768, %s4359_s3, %s2497_s18  }
 0x470 PF: > { %s4459_s5 = sld [smem:[#allocation20_spill]]  ;;  %s4460_s14 = sld [smem:[#allocation21_spill]] }
 0x471   : > { %p3032_p5 = scmp.ge.s32.totalorder %s3776_s27, 2 }
 0x476   : > { %s2523_s30 = sand.u32 1, %s4459_s5   ;;  %p4461_p10 = scmp.ne.s32.totalorder %s4460_s14, 0 }
 0x477   : > { %s2524_s13 = scalar_lea.sflag [#allocation4], %s2523_s30 }
 0x478   : > { %p3018_p4 = pnand %p3032_p5, %p4461_p10 }
 0x47a   : > { %3759 = dma.done.wait (!%p3018_p4), %s2524_s13, 768  }
 0x47b   : > { %3761 = vsyncadd (!%p3018_p4), %s2524_s13, 4294966528  ;;  %s4462_s27 = sld [smem:[#allocation22_spill]]  ;;  %s4463_s17 = sld [smem:[#allocation23_spill]] }
 0x47c   : > { %s4464_s24 = smov %s3768_s25  ;;  %s4465_s25 = smov %s3772_s26 }
 0x481   : > { %p23_p6 = scmp.ge.s32.totalorder %s4462_s27, 6   ;;  %s4466_s26 = smov %s4463_s17 }
 0x483   :  { %25 = sbr.rel (!%p23_p6) target bundleno = 13 (0xd), region = 125 }
 0x48a   :  { %2529 = vsyncpa [#allocation3], 1 }
 0x48b   :  { %2531 = vsyncpa [#allocation3 + $0x1], 1 }
 0x48c   :  { %2532 = vsyncpa [#allocation6], 1 }
 0x48d   :  { %2533 = vsyncpa [#allocation9], 1 }
 0x48e   :  { %2534 = vsyncpa [#allocation12], 1 }
 0x48f   :  { %2536 = vsyncpa [#allocation12 + $0x1], 1 }
 0x490   :  { %2537 = vsyncpa [#allocation4], 1 }
 0x491   :  { %2539 = vsyncpa [#allocation4 + $0x1], 1 }

</bundles_post_ra>
